<compile_context>
chip_gen: v6e
topology: v6e:2x2x1
jax: 0.10.0
libtpu: 0.0.40
codegen_flags: <defaults>
</compile_context>

<pallas_src>
import functools

import jax
import jax.numpy as jnp
from jax.experimental import pallas as pl
from jax.experimental.pallas import tpu as pltpu

NEG_INF = -1e9
VMEM_LIMIT = 64 * 1024 * 1024


# ----------------------------- fused decoder layer --------------------------

def decoder_layer_kernel(x_ref, enc_ref, tpad_ref, spad_ref,
                         ln_g_ref, ln_b_ref,
                         swqkv_ref, swo_ref,
                         ewq_ref, ewkv_ref, ewo_ref,
                         w1_ref, b1_ref, w2_ref, b2_ref,
                         *rest, n_head, head_dim, emit_attn, eps=1e-6):
    if emit_attn:
        out_ref, attn_ref, ctx_ref = rest
    else:
        out_ref, ctx_ref = rest
        attn_ref = None
    H = n_head * head_dim

    x = x_ref[0].astype(jnp.float32)        # (S, H) residual stream (f32 math)
    enc16 = enc_ref[0]                      # (Skv, H) bf16 encoder output
    S = x.shape[0]
    Skv = enc16.shape[0]
    g = ln_g_ref[...]                       # (1, H) f32
    b = ln_b_ref[...]                       # (1, H) f32

    # Additive masks rebuilt in-kernel from tiny pad vectors (saves the
    # (S*S + S*Skv)*4-byte mask DMA per batch element per layer).
    tpad = tpad_ref[0]                      # (1, S)   0 / NEG_INF over target keys
    spad = spad_ref[0]                      # (1, Skv) 0 / NEG_INF over source keys
    row = jax.lax.broadcasted_iota(jnp.int32, (S, S), 0)
    col = jax.lax.broadcasted_iota(jnp.int32, (S, S), 1)
    causal = jnp.where(col > row, NEG_INF, 0.0)
    tmask = jnp.maximum(causal + tpad, NEG_INF)       # (S, S) additive
    emask = spad                                       # (1, Skv), broadcasts

    def ln(v):                              # shared LayerNorm (one per layer,
        mu = jnp.mean(v, axis=-1, keepdims=True)       # as in the PyTorch module)
        var = jnp.mean((v - mu) ** 2, axis=-1, keepdims=True)
        return (v - mu) * jax.lax.rsqrt(var + eps) * g + b

    def attend(q16, k16, v16, add_mask, wo16, attn_out_ref):
        # Per-head scores/softmax (scale folded into the Q weights); head
        # contexts are written into the (S, H) bf16 VMEM slab, then ONE
        # full-depth (S,H)@(H,H) output-projection matmul runs on the MXU.
        # TODO(synk): static unroll + sub-128 head slices are fine at toy
        #   sizes; use lax.fori_loop and 128-aligned heads at realistic sizes.
        for h in range(n_head):
            sl = slice(h * head_dim, (h + 1) * head_dim)
            s = jax.lax.dot_general(q16[:, sl], k16[:, sl],
                                    (((1,), (1,)), ((), ())),
                                    preferred_element_type=jnp.float32)
            s = s + add_mask
            s = s - jnp.max(s, axis=-1, keepdims=True)
            e = jnp.exp(s)
            p = e * pl.reciprocal(jnp.sum(e, axis=-1, keepdims=True), approx=True)
            if attn_out_ref is not None:
                attn_out_ref[0, h] = p.astype(attn_out_ref.dtype)
            ctx = jnp.dot(p.astype(jnp.bfloat16), v16[:, sl],
                          preferred_element_type=jnp.float32)
            ctx_ref[:, sl] = ctx.astype(jnp.bfloat16)
        return jnp.dot(ctx_ref[...], wo16, preferred_element_type=jnp.float32)

    # ---- self attention ----
    nx = ln(x)
    qkv = jnp.dot(nx.astype(jnp.bfloat16), swqkv_ref[...],
                  preferred_element_type=jnp.float32)          # (S, 3H)
    qkv16 = qkv.astype(jnp.bfloat16)
    x = x + attend(qkv16[:, :H], qkv16[:, H:2 * H], qkv16[:, 2 * H:],
                   tmask, swo_ref[...], None)

    # ---- encoder (cross) attention ----
    nx = ln(x)
    q16 = jnp.dot(nx.astype(jnp.bfloat16), ewq_ref[...],
                  preferred_element_type=jnp.float32).astype(jnp.bfloat16)
    kv = jnp.dot(enc16, ewkv_ref[...], preferred_element_type=jnp.float32)
    kv16 = kv.astype(jnp.bfloat16)
    x = x + attend(q16, kv16[:, :H], kv16[:, H:], emask, ewo_ref[...], attn_ref)

    # ---- position-wise FFN (Conv1d k=1 == Linear) ----
    nx = ln(x)
    h1 = jnp.dot(nx.astype(jnp.bfloat16), w1_ref[...],
                 preferred_element_type=jnp.float32) + b1_ref[...]
    h1 = jnp.maximum(h1, 0.0)
    y = jnp.dot(h1.astype(jnp.bfloat16), w2_ref[...],
                preferred_element_type=jnp.float32) + b2_ref[...]

    out_ref[0] = (x + y).astype(out_ref.dtype)


def _layer_cost(B, S, Skv, H, F, n_head, x, enc, tpad, spad, layer, emit_attn):
    flops = 2 * B * (S * H * 3 * H          # self qkv
                     + 2 * S * S * H        # self scores + p@v
                     + S * H * H            # self out proj
                     + S * H * H            # cross q
                     + Skv * H * 2 * H      # cross kv
                     + 2 * S * Skv * H      # cross scores + p@v
                     + S * H * H            # cross out proj
                     + 2 * S * H * F)       # ffn
    transcendentals = B * (n_head * (S * S + S * Skv) + 8 * S)
    in_bytes = (x.size * x.dtype.itemsize + enc.size * enc.dtype.itemsize
                + tpad.size * 4 + spad.size * 4
                + sum(int(v.size) * v.dtype.itemsize for v in layer.values()))
    out_bytes = B * S * H * 2 + (B * n_head * S * Skv * 4 if emit_attn else 0)
    return pl.CostEstimate(flops=int(flops), transcendentals=int(transcendentals),
                           bytes_accessed=int(in_bytes + out_bytes))


def decoder_layer(x, enc_out16, tgt_pad_add, src_pad_add, layer, n_head, emit_attn):
    B, S, H = x.shape
    Skv = enc_out16.shape[1]
    F = layer["ffn_w1"].shape[1]
    head_dim = H // n_head
    kernel = functools.partial(decoder_layer_kernel, n_head=n_head,
                               head_dim=head_dim, emit_attn=emit_attn)

    rep = lambda b: (0, 0)
    in_specs = [
        pl.BlockSpec((1, S, H), lambda b: (b, 0, 0)),        # x (bf16)
        pl.BlockSpec((1, Skv, H), lambda b: (b, 0, 0)),      # encoder output (bf16)
        pl.BlockSpec((1, 1, S), lambda b: (b, 0, 0)),        # target pad additive vec
        pl.BlockSpec((1, 1, Skv), lambda b: (b, 0, 0)),      # source pad additive vec
        pl.BlockSpec((1, H), rep),                           # ln gamma (f32)
        pl.BlockSpec((1, H), rep),                           # ln beta (f32)
        pl.BlockSpec((H, 3 * H), rep),                       # self qkv (bf16, q-scale folded)
        pl.BlockSpec((H, H), rep),                           # self wo (bf16)
        pl.BlockSpec((H, H), rep),                           # enc wq (bf16, scale folded)
        pl.BlockSpec((H, 2 * H), rep),                       # enc kv (bf16)
        pl.BlockSpec((H, H), rep),                           # enc wo (bf16)
        pl.BlockSpec((H, F), rep),                           # ffn w1 (bf16)
        pl.BlockSpec((1, F), rep),                           # ffn b1 (f32)
        pl.BlockSpec((F, H), rep),                           # ffn w2 (bf16)
        pl.BlockSpec((1, H), rep),                           # ffn b2 (f32)
    ]
    out_x_shape = jax.ShapeDtypeStruct((B, S, H), jnp.bfloat16)
    out_x_spec = pl.BlockSpec((1, S, H), lambda b: (b, 0, 0))
    if emit_attn:
        out_shape = (out_x_shape,
                     jax.ShapeDtypeStruct((B, n_head, S, Skv), jnp.float32))
        out_specs = (out_x_spec,
                     pl.BlockSpec((1, n_head, S, Skv), lambda b: (b, 0, 0, 0)))
    else:
        out_shape = out_x_shape
        out_specs = out_x_spec

    result = pl.pallas_call(
        kernel,
        out_shape=out_shape,
        grid=(B,),
        in_specs=in_specs,
        out_specs=out_specs,
        scratch_shapes=[pltpu.VMEM((S, H), jnp.bfloat16)],   # per-head context slab
        compiler_params=pltpu.CompilerParams(
            dimension_semantics=("parallel",),
            vmem_limit_bytes=VMEM_LIMIT),
        cost_estimate=_layer_cost(B, S, Skv, H, F, n_head,
                                  x, enc_out16, tgt_pad_add, src_pad_add,
                                  layer, emit_attn),
    )(x, enc_out16, tgt_pad_add, src_pad_add,
      layer["ln_gamma"], layer["ln_beta"],
      layer["self_wqkv"], layer["self_wo"],
      layer["enc_wq"], layer["enc_wkv"], layer["enc_wo"],
      layer["ffn_w1"], layer["ffn_b1"], layer["ffn_w2"], layer["ffn_b2"])

    if emit_attn:
        return result[0], result[1]
    return result, None


# --------------------- final LayerNorm + vocab projection -------------------

def final_ln_kernel(x_ref, g_ref, b_ref, o_ref, *, eps=1e-6):
    x = x_ref[0].astype(jnp.float32)
    mu = jnp.mean(x, axis=-1, keepdims=True)
    var = jnp.mean((x - mu) ** 2, axis=-1, keepdims=True)
    o_ref[0] = ((x - mu) * jax.lax.rsqrt(var + eps) * g_ref[...] + b_ref[...]
                ).astype(o_ref.dtype)


def final_layernorm(x, gamma, beta):
    # LN computed ONCE per batch element (hoisted out of the vocab-tile loop),
    # emitted as bf16 for the projection matmul.
    B, S, H = x.shape
    return pl.pallas_call(
        final_ln_kernel,
        out_shape=jax.ShapeDtypeStruct((B, S, H), jnp.bfloat16),
        grid=(B,),
        in_specs=[pl.BlockSpec((1, S, H), lambda b: (b, 0, 0)),
                  pl.BlockSpec((1, H), lambda b: (0, 0)),
                  pl.BlockSpec((1, H), lambda b: (0, 0))],
        out_specs=pl.BlockSpec((1, S, H), lambda b: (b, 0, 0)),
        compiler_params=pltpu.CompilerParams(dimension_semantics=("parallel",)),
    )(x, gamma, beta)


def proj_kernel(x_ref, w_ref, o_ref):
    o_ref[0] = jnp.dot(x_ref[0], w_ref[...],
                       preferred_element_type=jnp.float32).astype(o_ref.dtype)


def _pick_vocab_tile(V):
    for tv in (1024, 512, 256, 128):
        if V % tv == 0:
            return tv
    return V  # unreachable when V is pre-padded to a multiple of 128


def vocab_projection(x16, w16):
    # Pure matmul kernel.  Grid is (nv, B) with batch INNERMOST so each (H,tv)
    # bf16 weight tile is DMA'd once and reused across the whole batch.
    B, S, H = x16.shape
    Vp = w16.shape[1]
    tv = _pick_vocab_tile(Vp)
    nv = Vp // tv
    flops = 2 * B * S * H * Vp
    bytes_accessed = (x16.size * 2) * nv + w16.size * 2 + B * S * Vp * 4
    return pl.pallas_call(
        proj_kernel,
        out_shape=jax.ShapeDtypeStruct((B, S, Vp), jnp.float32),
        grid=(nv, B),
        in_specs=[pl.BlockSpec((1, S, H), lambda v, b: (b, 0, 0)),
                  pl.BlockSpec((H, tv), lambda v, b: (0, v))],
        out_specs=pl.BlockSpec((1, S, tv), lambda v, b: (b, 0, v)),
        compiler_params=pltpu.CompilerParams(
            dimension_semantics=("parallel", "parallel"),
            vmem_limit_bytes=VMEM_LIMIT),
        cost_estimate=pl.CostEstimate(flops=int(flops), transcendentals=0,
                                      bytes_accessed=int(bytes_accessed)),
    )(x16, w16)


# ------------------------------ JAX glue -------------------------------------

def create_positional_encoding(max_len, hidden_dim):
    pos = jnp.arange(max_len, dtype=jnp.float32)[:, None]
    i = jnp.arange(hidden_dim, dtype=jnp.float32)[None, :]
    angle = pos / jnp.power(10000.0, (2.0 * jnp.floor(i / 2.0)) / hidden_dim)
    even = (jnp.arange(hidden_dim) % 2) == 0
    pe = jnp.where(even[None, :], jnp.sin(angle), jnp.cos(angle))
    pe = pe.at[0].set(0.0)  # row 0 reserved for padding positions
    return pe.astype(jnp.float32)


def create_position_vector(target, pad_idx):
    S = target.shape[1]
    positions = jnp.arange(1, S + 1, dtype=jnp.int32)[None, :]
    return jnp.where(target != pad_idx, positions, 0)


def init_decoder_params(key, *, vocab, hidden, n_head, ff_dim, n_layer,
                        max_len, pad_idx):
    keys = jax.random.split(key, 1 + n_layer)
    emb = jax.random.normal(keys[0], (vocab, hidden), jnp.float32) * (hidden ** -0.5)
    emb = emb.at[pad_idx].set(0.0)  # padding_idx row zeroed

    # Pre-transposed, lane-padded bf16 vocab-projection weight (tied weights).
    vocab_pad = ((vocab + 127) // 128) * 128
    proj = jnp.zeros((hidden, vocab_pad), jnp.float32).at[:, :vocab].set(emb.T)

    params = {
        "token_embedding": emb,
        "proj_w": proj.astype(jnp.bfloat16),
        "pos_embedding": create_positional_encoding(max_len + 1, hidden),
        "final_ln_gamma": jnp.ones((1, hidden), jnp.float32),
        "final_ln_beta": jnp.zeros((1, hidden), jnp.float32),
        "layers": [],
    }
    std = hidden ** -0.5
    head_dim = hidden // n_head
    qscale = head_dim ** -0.5  # folded into the Q projection weights
    bf16 = lambda a: a.astype(jnp.bfloat16)
    for l in range(n_layer):
        lk = jax.random.split(keys[1 + l], 10)
        self_wq = jax.random.normal(lk[0], (hidden, hidden), jnp.float32) * std
        self_wk = jax.random.normal(lk[1], (hidden, hidden), jnp.float32) * std
        self_wv = jax.random.normal(lk[2], (hidden, hidden), jnp.float32) * std
        enc_wq = jax.random.normal(lk[4], (hidden, hidden), jnp.float32) * std
        enc_wk = jax.random.normal(lk[5], (hidden, hidden), jnp.float32) * std
        enc_wv = jax.random.normal(lk[6], (hidden, hidden), jnp.float32) * std
        layer = {
            # ONE shared LayerNorm per DecoderLayer (matches the PyTorch module,
            # which reuses self.layer_norm at all three sites).
            "ln_gamma": jnp.ones((1, hidden), jnp.float32),
            "ln_beta": jnp.zeros((1, hidden), jnp.float32),
            "self_wqkv": bf16(jnp.concatenate(
                [self_wq * qscale, self_wk, self_wv], axis=1)),           # (H, 3H)
            "self_wo": bf16(jax.random.normal(lk[3], (hidden, hidden), jnp.float32) * std),
            "enc_wq": bf16(enc_wq * qscale),                              # (H, H)
            "enc_wkv": bf16(jnp.concatenate([enc_wk, enc_wv], axis=1)),   # (H, 2H)
            "enc_wo": bf16(jax.random.normal(lk[7], (hidden, hidden), jnp.float32) * std),
            "ffn_w1": bf16(jax.random.normal(lk[8], (hidden, ff_dim), jnp.float32) * std),
            "ffn_b1": jnp.zeros((1, ff_dim), jnp.float32),
            "ffn_w2": bf16(jax.random.normal(lk[9], (ff_dim, hidden), jnp.float32) * (ff_dim ** -0.5)),
            "ffn_b2": jnp.zeros((1, hidden), jnp.float32),
        }
        params["layers"].append(layer)
    return params


def decoder_forward(params, source, target, encoder_output, *, pad_idx, n_head):
    # NOTE: the reference forward uses `source` (free variable) to build masks;
    # here it is passed explicitly.
    H = params["token_embedding"].shape[1]
    V = params["token_embedding"].shape[0]

    # Tiny additive pad vectors; the full (S,S)/(S,Skv) masks are rebuilt
    # inside the layer kernel from these + an in-kernel causal iota.
    tgt_pad_add = jnp.where(target == pad_idx, NEG_INF, 0.0
                            ).astype(jnp.float32)[:, None, :]   # (B, 1, S_t)
    src_pad_add = jnp.where(source == pad_idx, NEG_INF, 0.0
                            ).astype(jnp.float32)[:, None, :]   # (B, 1, S_s)

    target_pos = create_position_vector(target, pad_idx)
    x = jnp.take(params["token_embedding"], target, axis=0) * (H ** 0.5)
    x = x + jnp.take(params["pos_embedding"], target_pos, axis=0)
    # TODO(synk): nn.Dropout is identity in eval mode; not applied.
    x = x.astype(jnp.bfloat16)                       # bf16 residual-stream handoff
    enc16 = encoder_output.astype(jnp.bfloat16)

    attn_map = None
    n_layers = len(params["layers"])
    for li, layer in enumerate(params["layers"]):
        # Only the last layer's cross-attention map is returned by the reference.
        emit_attn = (li == n_layers - 1)
        x, amap = decoder_layer(x, enc16, tgt_pad_add, src_pad_add,
                                layer, n_head, emit_attn)
        if amap is not None:
            attn_map = amap

    y = final_layernorm(x, params["final_ln_gamma"], params["final_ln_beta"])
    logits = vocab_projection(y, params["proj_w"])
    if logits.shape[-1] != V:          # drop the lane-padding columns (toy vocab)
        logits = logits[..., :V]
    return logits, attn_map


# --------------------------------- main ---------------------------------------

if __name__ == "__main__":
    B, S_T, S_S = 2, 8, 8
    HIDDEN, N_HEAD, FF, N_LAYER = 32, 4, 64, 2
    VOCAB, MAX_LEN, PAD = 40, 16, 0

    key = jax.random.PRNGKey(0)
    k_par, k_tgt, k_src, k_enc = jax.random.split(key, 4)

    params = init_decoder_params(k_par, vocab=VOCAB, hidden=HIDDEN, n_head=N_HEAD,
                                 ff_dim=FF, n_layer=N_LAYER, max_len=MAX_LEN,
                                 pad_idx=PAD)

    target = jax.random.randint(k_tgt, (B, S_T), 1, VOCAB, dtype=jnp.int32)
    target = target.at[1, 6:].set(PAD)             # some padding on row 1
    source = jax.random.randint(k_src, (B, S_S), 1, VOCAB, dtype=jnp.int32)
    source = source.at[0, 7:].set(PAD)
    encoder_output = jax.random.normal(k_enc, (B, S_S, HIDDEN), jnp.float32)

    logits, attn_map = decoder_forward(params, source, target, encoder_output,
                                       pad_idx=PAD, n_head=N_HEAD)
    jax.block_until_ready((logits, attn_map))
    assert logits.shape == (B, S_T, VOCAB)
    assert attn_map.shape == (B, N_HEAD, S_T, S_S)
    assert bool(jnp.all(jnp.isfinite(logits)))
    assert bool(jnp.all(jnp.isfinite(attn_map)))
    print("KERNEL_OK")
</pallas_src>

<mosaic_0001>
module attributes {stable_mosaic.version = 11 : i64} {
  func.func @decoder_layer_kernel(%arg0: i32, %arg1: memref<1x8x32xbf16, #tpu.memory_space<vmem>>, %arg2: memref<1x8x32xbf16, #tpu.memory_space<vmem>>, %arg3: memref<1x1x8xf32, #tpu.memory_space<vmem>>, %arg4: memref<1x1x8xf32, #tpu.memory_space<vmem>>, %arg5: memref<1x32xf32, #tpu.memory_space<vmem>>, %arg6: memref<1x32xf32, #tpu.memory_space<vmem>>, %arg7: memref<32x96xbf16, #tpu.memory_space<vmem>>, %arg8: memref<32x32xbf16, #tpu.memory_space<vmem>>, %arg9: memref<32x32xbf16, #tpu.memory_space<vmem>>, %arg10: memref<32x64xbf16, #tpu.memory_space<vmem>>, %arg11: memref<32x32xbf16, #tpu.memory_space<vmem>>, %arg12: memref<32x64xbf16, #tpu.memory_space<vmem>>, %arg13: memref<1x64xf32, #tpu.memory_space<vmem>>, %arg14: memref<64x32xbf16, #tpu.memory_space<vmem>>, %arg15: memref<1x32xf32, #tpu.memory_space<vmem>>, %arg16: memref<1x8x32xbf16, #tpu.memory_space<vmem>>, %arg17: memref<8x32xbf16, #tpu.memory_space<vmem>>) attributes {dimension_semantics = [#tpu.dimension_semantics<parallel>], iteration_bounds = array<i64: 2>, scalar_prefetch = 0 : i64, scratch_operands = 1 : i64, tpu.core_type = #tpu.core_type<tc>, window_params = [{transform_indices = @transform_0, window_bounds = array<i64: 1, 8, 32>}, {transform_indices = @transform_1, window_bounds = array<i64: 1, 8, 32>}, {transform_indices = @transform_2, window_bounds = array<i64: 1, 1, 8>}, {transform_indices = @transform_3, window_bounds = array<i64: 1, 1, 8>}, {pipeline_mode = #tpu.pipeline_mode<synchronous>, transform_indices = @transform_4, window_bounds = array<i64: 1, 32>}, {pipeline_mode = #tpu.pipeline_mode<synchronous>, transform_indices = @transform_5, window_bounds = array<i64: 1, 32>}, {pipeline_mode = #tpu.pipeline_mode<synchronous>, transform_indices = @transform_6, window_bounds = array<i64: 32, 96>}, {pipeline_mode = #tpu.pipeline_mode<synchronous>, transform_indices = @transform_7, window_bounds = array<i64: 32, 32>}, {pipeline_mode = #tpu.pipeline_mode<synchronous>, transform_indices = @transform_8, window_bounds = array<i64: 32, 32>}, {pipeline_mode = #tpu.pipeline_mode<synchronous>, transform_indices = @transform_9, window_bounds = array<i64: 32, 64>}, {pipeline_mode = #tpu.pipeline_mode<synchronous>, transform_indices = @transform_10, window_bounds = array<i64: 32, 32>}, {pipeline_mode = #tpu.pipeline_mode<synchronous>, transform_indices = @transform_11, window_bounds = array<i64: 32, 64>}, {pipeline_mode = #tpu.pipeline_mode<synchronous>, transform_indices = @transform_12, window_bounds = array<i64: 1, 64>}, {pipeline_mode = #tpu.pipeline_mode<synchronous>, transform_indices = @transform_13, window_bounds = array<i64: 64, 32>}, {pipeline_mode = #tpu.pipeline_mode<synchronous>, transform_indices = @transform_14, window_bounds = array<i64: 1, 32>}, {transform_indices = @transform_15, window_bounds = array<i64: 1, 8, 32>}]} {
    %c0 = arith.constant 0 : index
    %c0_0 = arith.constant 0 : index
    %c0_1 = arith.constant 0 : index
    %0 = vector.load %arg1[%c0, %c0_0, %c0_1] : memref<1x8x32xbf16, #tpu.memory_space<vmem>>, vector<1x8x32xbf16>
    %1 = vector.shape_cast %0 : vector<1x8x32xbf16> to vector<8x32xbf16>
    %2 = arith.extf %1 : vector<8x32xbf16> to vector<8x32xf32>
    %c0_2 = arith.constant 0 : index
    %c0_3 = arith.constant 0 : index
    %c0_4 = arith.constant 0 : index
    %3 = vector.load %arg2[%c0_2, %c0_3, %c0_4] : memref<1x8x32xbf16, #tpu.memory_space<vmem>>, vector<1x8x32xbf16>
    %4 = vector.shape_cast %3 : vector<1x8x32xbf16> to vector<8x32xbf16>
    %c0_5 = arith.constant 0 : index
    %c0_6 = arith.constant 0 : index
    %5 = vector.load %arg5[%c0_5, %c0_6] : memref<1x32xf32, #tpu.memory_space<vmem>>, vector<1x32xf32>
    %c0_7 = arith.constant 0 : index
    %c0_8 = arith.constant 0 : index
    %6 = vector.load %arg6[%c0_7, %c0_8] : memref<1x32xf32, #tpu.memory_space<vmem>>, vector<1x32xf32>
    %c0_9 = arith.constant 0 : index
    %c0_10 = arith.constant 0 : index
    %c0_11 = arith.constant 0 : index
    %7 = vector.load %arg3[%c0_9, %c0_10, %c0_11] : memref<1x1x8xf32, #tpu.memory_space<vmem>>, vector<1x1x8xf32>
    %8 = vector.shape_cast %7 : vector<1x1x8xf32> to vector<1x8xf32>
    %c0_12 = arith.constant 0 : index
    %c0_13 = arith.constant 0 : index
    %c0_14 = arith.constant 0 : index
    %9 = vector.load %arg4[%c0_12, %c0_13, %c0_14] : memref<1x1x8xf32, #tpu.memory_space<vmem>>, vector<1x1x8xf32>
    %10 = vector.shape_cast %9 : vector<1x1x8xf32> to vector<1x8xf32>
    %11 = tpu.iota {dimensions = array<i32: 0>} : vector<8x8xi32>
    %12 = tpu.iota {dimensions = array<i32: 1>} : vector<8x8xi32>
    %13 = arith.cmpi sgt, %12, %11 : vector<8x8xi32>
    %cst = arith.constant -1.000000e+09 : f32
    %cst_15 = arith.constant 0.000000e+00 : f32
    %14 = vector.broadcast %cst : f32 to vector<8x8xf32>
    %15 = vector.broadcast %cst_15 : f32 to vector<8x8xf32>
    %16 = arith.select %13, %14, %15 : vector<8x8xi1>, vector<8x8xf32>
    %17 = vector.broadcast %8 : vector<1x8xf32> to vector<8x8xf32>
    %18 = arith.addf %16, %17 : vector<8x8xf32>
    %cst_16 = arith.constant -1.000000e+09 : f32
    %19 = vector.broadcast %cst_16 : f32 to vector<8x8xf32>
    %20 = arith.maximumf %18, %19 : vector<8x8xf32>
    %cst_17 = arith.constant dense<0.000000e+00> : vector<8xf32>
    %21 = vector.multi_reduction <add>, %2, %cst_17 [1] : vector<8x32xf32> to vector<8xf32>
    %22 = vector.shape_cast %21 : vector<8xf32> to vector<8x1xf32>
    %cst_18 = arith.constant 3.200000e+01 : f32
    %23 = vector.broadcast %cst_18 : f32 to vector<8x1xf32>
    %24 = arith.divf %22, %23 : vector<8x1xf32>
    %25 = vector.broadcast %24 : vector<8x1xf32> to vector<8x32xf32>
    %26 = arith.subf %2, %25 : vector<8x32xf32>
    %27 = arith.mulf %26, %26 : vector<8x32xf32>
    %cst_19 = arith.constant dense<0.000000e+00> : vector<8xf32>
    %28 = vector.multi_reduction <add>, %27, %cst_19 [1] : vector<8x32xf32> to vector<8xf32>
    %29 = vector.shape_cast %28 : vector<8xf32> to vector<8x1xf32>
    %cst_20 = arith.constant 3.200000e+01 : f32
    %30 = vector.broadcast %cst_20 : f32 to vector<8x1xf32>
    %31 = arith.divf %29, %30 : vector<8x1xf32>
    %32 = vector.broadcast %24 : vector<8x1xf32> to vector<8x32xf32>
    %33 = arith.subf %2, %32 : vector<8x32xf32>
    %cst_21 = arith.constant 9.99999997E-7 : f32
    %34 = vector.broadcast %cst_21 : f32 to vector<8x1xf32>
    %35 = arith.addf %31, %34 : vector<8x1xf32>
    %36 = math.rsqrt %35 : vector<8x1xf32>
    %37 = vector.broadcast %36 : vector<8x1xf32> to vector<8x32xf32>
    %38 = arith.mulf %33, %37 : vector<8x32xf32>
    %39 = vector.broadcast %5 : vector<1x32xf32> to vector<8x32xf32>
    %40 = arith.mulf %38, %39 : vector<8x32xf32>
    %41 = vector.broadcast %6 : vector<1x32xf32> to vector<8x32xf32>
    %42 = arith.addf %40, %41 : vector<8x32xf32>
    %43 = arith.truncf %42 : vector<8x32xf32> to vector<8x32xbf16>
    %c0_22 = arith.constant 0 : index
    %c0_23 = arith.constant 0 : index
    %44 = vector.load %arg7[%c0_22, %c0_23] : memref<32x96xbf16, #tpu.memory_space<vmem>>, vector<32x96xbf16>
    %cst_24 = arith.constant dense<0.000000e+00> : vector<8x96xf32>
    %45 = tpu.matmul %43, %44, %cst_24 {dimension_numbers = #tpu.dot_dimension_numbers<[1], [0], [0], [1], [0, 0, 1, 1], [], []>} : vector<8x32xbf16>, vector<32x96xbf16>, vector<8x96xf32> -> vector<8x96xf32>
    %46 = arith.truncf %45 : vector<8x96xf32> to vector<8x96xbf16>
    %47 = vector.extract_strided_slice %46 {offsets = [0, 0], sizes = [8, 32], strides = [1, 1]} : vector<8x96xbf16> to vector<8x32xbf16>
    %48 = vector.extract_strided_slice %46 {offsets = [0, 32], sizes = [8, 32], strides = [1, 1]} : vector<8x96xbf16> to vector<8x32xbf16>
    %49 = vector.extract_strided_slice %46 {offsets = [0, 64], sizes = [8, 32], strides = [1, 1]} : vector<8x96xbf16> to vector<8x32xbf16>
    %c0_25 = arith.constant 0 : index
    %c0_26 = arith.constant 0 : index
    %50 = vector.load %arg8[%c0_25, %c0_26] : memref<32x32xbf16, #tpu.memory_space<vmem>>, vector<32x32xbf16>
    %51 = vector.extract_strided_slice %47 {offsets = [0, 0], sizes = [8, 8], strides = [1, 1]} : vector<8x32xbf16> to vector<8x8xbf16>
    %52 = vector.extract_strided_slice %48 {offsets = [0, 0], sizes = [8, 8], strides = [1, 1]} : vector<8x32xbf16> to vector<8x8xbf16>
    %cst_27 = arith.constant dense<0.000000e+00> : vector<8x8xf32>
    %53 = tpu.matmul %51, %52, %cst_27 {dimension_numbers = #tpu.dot_dimension_numbers<[1], [1], [0], [0], [0, 0, 1, 0], [], []>} : vector<8x8xbf16>, vector<8x8xbf16>, vector<8x8xf32> -> vector<8x8xf32>
    %54 = arith.addf %53, %20 : vector<8x8xf32>
    %cst_28 = arith.constant dense<0xFF800000> : vector<8xf32>
    %55 = vector.multi_reduction <maximumf>, %54, %cst_28 [1] : vector<8x8xf32> to vector<8xf32>
    %56 = vector.shape_cast %55 : vector<8xf32> to vector<8x1xf32>
    %57 = vector.broadcast %56 : vector<8x1xf32> to vector<8x8xf32>
    %58 = arith.subf %54, %57 : vector<8x8xf32>
    %59 = math.exp %58 : vector<8x8xf32>
    %cst_29 = arith.constant dense<0.000000e+00> : vector<8xf32>
    %60 = vector.multi_reduction <add>, %59, %cst_29 [1] : vector<8x8xf32> to vector<8xf32>
    %61 = vector.shape_cast %60 : vector<8xf32> to vector<8x1xf32>
    %62 = tpu.reciprocal %61 {approx = true} : vector<8x1xf32> -> vector<8x1xf32>
    %63 = vector.broadcast %62 : vector<8x1xf32> to vector<8x8xf32>
    %64 = arith.mulf %59, %63 : vector<8x8xf32>
    %65 = arith.truncf %64 : vector<8x8xf32> to vector<8x8xbf16>
    %66 = vector.extract_strided_slice %49 {offsets = [0, 0], sizes = [8, 8], strides = [1, 1]} : vector<8x32xbf16> to vector<8x8xbf16>
    %cst_30 = arith.constant dense<0.000000e+00> : vector<8x8xf32>
    %67 = tpu.matmul %65, %66, %cst_30 {dimension_numbers = #tpu.dot_dimension_numbers<[1], [0], [0], [1], [0, 0, 1, 1], [], []>} : vector<8x8xbf16>, vector<8x8xbf16>, vector<8x8xf32> -> vector<8x8xf32>
    %68 = arith.truncf %67 : vector<8x8xf32> to vector<8x8xbf16>
    %c0_31 = arith.constant 0 : index
    %c0_32 = arith.constant 0 : index
    %69 = vector.load %arg17[%c0_31, %c0_32] : memref<8x32xbf16, #tpu.memory_space<vmem>>, vector<8x8xbf16>
    tpu.vector_store %arg17[%c0_31, %c0_32], %68 {strides = array<i32>} : memref<8x32xbf16, #tpu.memory_space<vmem>>, vector<8x8xbf16>,
    %70 = vector.extract_strided_slice %47 {offsets = [0, 8], sizes = [8, 8], strides = [1, 1]} : vector<8x32xbf16> to vector<8x8xbf16>
    %71 = vector.extract_strided_slice %48 {offsets = [0, 8], sizes = [8, 8], strides = [1, 1]} : vector<8x32xbf16> to vector<8x8xbf16>
    %cst_33 = arith.constant dense<0.000000e+00> : vector<8x8xf32>
    %72 = tpu.matmul %70, %71, %cst_33 {dimension_numbers = #tpu.dot_dimension_numbers<[1], [1], [0], [0], [0, 0, 1, 0], [], []>} : vector<8x8xbf16>, vector<8x8xbf16>, vector<8x8xf32> -> vector<8x8xf32>
    %73 = arith.addf %72, %20 : vector<8x8xf32>
    %cst_34 = arith.constant dense<0xFF800000> : vector<8xf32>
    %74 = vector.multi_reduction <maximumf>, %73, %cst_34 [1] : vector<8x8xf32> to vector<8xf32>
    %75 = vector.shape_cast %74 : vector<8xf32> to vector<8x1xf32>
    %76 = vector.broadcast %75 : vector<8x1xf32> to vector<8x8xf32>
    %77 = arith.subf %73, %76 : vector<8x8xf32>
    %78 = math.exp %77 : vector<8x8xf32>
    %cst_35 = arith.constant dense<0.000000e+00> : vector<8xf32>
    %79 = vector.multi_reduction <add>, %78, %cst_35 [1] : vector<8x8xf32> to vector<8xf32>
    %80 = vector.shape_cast %79 : vector<8xf32> to vector<8x1xf32>
    %81 = tpu.reciprocal %80 {approx = true} : vector<8x1xf32> -> vector<8x1xf32>
    %82 = vector.broadcast %81 : vector<8x1xf32> to vector<8x8xf32>
    %83 = arith.mulf %78, %82 : vector<8x8xf32>
    %84 = arith.truncf %83 : vector<8x8xf32> to vector<8x8xbf16>
    %85 = vector.extract_strided_slice %49 {offsets = [0, 8], sizes = [8, 8], strides = [1, 1]} : vector<8x32xbf16> to vector<8x8xbf16>
    %cst_36 = arith.constant dense<0.000000e+00> : vector<8x8xf32>
    %86 = tpu.matmul %84, %85, %cst_36 {dimension_numbers = #tpu.dot_dimension_numbers<[1], [0], [0], [1], [0, 0, 1, 1], [], []>} : vector<8x8xbf16>, vector<8x8xbf16>, vector<8x8xf32> -> vector<8x8xf32>
    %87 = arith.truncf %86 : vector<8x8xf32> to vector<8x8xbf16>
    %c0_37 = arith.constant 0 : index
    %c8 = arith.constant 8 : index
    %88 = vector.load %arg17[%c0_37, %c8] : memref<8x32xbf16, #tpu.memory_space<vmem>>, vector<8x8xbf16>
    tpu.vector_store %arg17[%c0_37, %c8], %87 {strides = array<i32>} : memref<8x32xbf16, #tpu.memory_space<vmem>>, vector<8x8xbf16>,
    %89 = vector.extract_strided_slice %47 {offsets = [0, 16], sizes = [8, 8], strides = [1, 1]} : vector<8x32xbf16> to vector<8x8xbf16>
    %90 = vector.extract_strided_slice %48 {offsets = [0, 16], sizes = [8, 8], strides = [1, 1]} : vector<8x32xbf16> to vector<8x8xbf16>
    %cst_38 = arith.constant dense<0.000000e+00> : vector<8x8xf32>
    %91 = tpu.matmul %89, %90, %cst_38 {dimension_numbers = #tpu.dot_dimension_numbers<[1], [1], [0], [0], [0, 0, 1, 0], [], []>} : vector<8x8xbf16>, vector<8x8xbf16>, vector<8x8xf32> -> vector<8x8xf32>
    %92 = arith.addf %91, %20 : vector<8x8xf32>
    %cst_39 = arith.constant dense<0xFF800000> : vector<8xf32>
    %93 = vector.multi_reduction <maximumf>, %92, %cst_39 [1] : vector<8x8xf32> to vector<8xf32>
    %94 = vector.shape_cast %93 : vector<8xf32> to vector<8x1xf32>
    %95 = vector.broadcast %94 : vector<8x1xf32> to vector<8x8xf32>
    %96 = arith.subf %92, %95 : vector<8x8xf32>
    %97 = math.exp %96 : vector<8x8xf32>
    %cst_40 = arith.constant dense<0.000000e+00> : vector<8xf32>
    %98 = vector.multi_reduction <add>, %97, %cst_40 [1] : vector<8x8xf32> to vector<8xf32>
    %99 = vector.shape_cast %98 : vector<8xf32> to vector<8x1xf32>
    %100 = tpu.reciprocal %99 {approx = true} : vector<8x1xf32> -> vector<8x1xf32>
    %101 = vector.broadcast %100 : vector<8x1xf32> to vector<8x8xf32>
    %102 = arith.mulf %97, %101 : vector<8x8xf32>
    %103 = arith.truncf %102 : vector<8x8xf32> to vector<8x8xbf16>
    %104 = vector.extract_strided_slice %49 {offsets = [0, 16], sizes = [8, 8], strides = [1, 1]} : vector<8x32xbf16> to vector<8x8xbf16>
    %cst_41 = arith.constant dense<0.000000e+00> : vector<8x8xf32>
    %105 = tpu.matmul %103, %104, %cst_41 {dimension_numbers = #tpu.dot_dimension_numbers<[1], [0], [0], [1], [0, 0, 1, 1], [], []>} : vector<8x8xbf16>, vector<8x8xbf16>, vector<8x8xf32> -> vector<8x8xf32>
    %106 = arith.truncf %105 : vector<8x8xf32> to vector<8x8xbf16>
    %c0_42 = arith.constant 0 : index
    %c16 = arith.constant 16 : index
    %107 = vector.load %arg17[%c0_42, %c16] : memref<8x32xbf16, #tpu.memory_space<vmem>>, vector<8x8xbf16>
    tpu.vector_store %arg17[%c0_42, %c16], %106 {strides = array<i32>} : memref<8x32xbf16, #tpu.memory_space<vmem>>, vector<8x8xbf16>,
    %108 = vector.extract_strided_slice %47 {offsets = [0, 24], sizes = [8, 8], strides = [1, 1]} : vector<8x32xbf16> to vector<8x8xbf16>
    %109 = vector.extract_strided_slice %48 {offsets = [0, 24], sizes = [8, 8], strides = [1, 1]} : vector<8x32xbf16> to vector<8x8xbf16>
    %cst_43 = arith.constant dense<0.000000e+00> : vector<8x8xf32>
    %110 = tpu.matmul %108, %109, %cst_43 {dimension_numbers = #tpu.dot_dimension_numbers<[1], [1], [0], [0], [0, 0, 1, 0], [], []>} : vector<8x8xbf16>, vector<8x8xbf16>, vector<8x8xf32> -> vector<8x8xf32>
    %111 = arith.addf %110, %20 : vector<8x8xf32>
    %cst_44 = arith.constant dense<0xFF800000> : vector<8xf32>
    %112 = vector.multi_reduction <maximumf>, %111, %cst_44 [1] : vector<8x8xf32> to vector<8xf32>
    %113 = vector.shape_cast %112 : vector<8xf32> to vector<8x1xf32>
    %114 = vector.broadcast %113 : vector<8x1xf32> to vector<8x8xf32>
    %115 = arith.subf %111, %114 : vector<8x8xf32>
    %116 = math.exp %115 : vector<8x8xf32>
    %cst_45 = arith.constant dense<0.000000e+00> : vector<8xf32>
    %117 = vector.multi_reduction <add>, %116, %cst_45 [1] : vector<8x8xf32> to vector<8xf32>
    %118 = vector.shape_cast %117 : vector<8xf32> to vector<8x1xf32>
    %119 = tpu.reciprocal %118 {approx = true} : vector<8x1xf32> -> vector<8x1xf32>
    %120 = vector.broadcast %119 : vector<8x1xf32> to vector<8x8xf32>
    %121 = arith.mulf %116, %120 : vector<8x8xf32>
    %122 = arith.truncf %121 : vector<8x8xf32> to vector<8x8xbf16>
    %123 = vector.extract_strided_slice %49 {offsets = [0, 24], sizes = [8, 8], strides = [1, 1]} : vector<8x32xbf16> to vector<8x8xbf16>
    %cst_46 = arith.constant dense<0.000000e+00> : vector<8x8xf32>
    %124 = tpu.matmul %122, %123, %cst_46 {dimension_numbers = #tpu.dot_dimension_numbers<[1], [0], [0], [1], [0, 0, 1, 1], [], []>} : vector<8x8xbf16>, vector<8x8xbf16>, vector<8x8xf32> -> vector<8x8xf32>
    %125 = arith.truncf %124 : vector<8x8xf32> to vector<8x8xbf16>
    %c0_47 = arith.constant 0 : index
    %c24 = arith.constant 24 : index
    %126 = vector.load %arg17[%c0_47, %c24] : memref<8x32xbf16, #tpu.memory_space<vmem>>, vector<8x8xbf16>
    tpu.vector_store %arg17[%c0_47, %c24], %125 {strides = array<i32>} : memref<8x32xbf16, #tpu.memory_space<vmem>>, vector<8x8xbf16>,
    %c0_48 = arith.constant 0 : index
    %c0_49 = arith.constant 0 : index
    %127 = vector.load %arg17[%c0_48, %c0_49] : memref<8x32xbf16, #tpu.memory_space<vmem>>, vector<8x32xbf16>
    %cst_50 = arith.constant dense<0.000000e+00> : vector<8x32xf32>
    %128 = tpu.matmul %127, %50, %cst_50 {dimension_numbers = #tpu.dot_dimension_numbers<[1], [0], [0], [1], [0, 0, 1, 1], [], []>} : vector<8x32xbf16>, vector<32x32xbf16>, vector<8x32xf32> -> vector<8x32xf32>
    %129 = arith.addf %2, %128 : vector<8x32xf32>
    %cst_51 = arith.constant dense<0.000000e+00> : vector<8xf32>
    %130 = vector.multi_reduction <add>, %129, %cst_51 [1] : vector<8x32xf32> to vector<8xf32>
    %131 = vector.shape_cast %130 : vector<8xf32> to vector<8x1xf32>
    %cst_52 = arith.constant 3.200000e+01 : f32
    %132 = vector.broadcast %cst_52 : f32 to vector<8x1xf32>
    %133 = arith.divf %131, %132 : vector<8x1xf32>
    %134 = vector.broadcast %133 : vector<8x1xf32> to vector<8x32xf32>
    %135 = arith.subf %129, %134 : vector<8x32xf32>
    %136 = arith.mulf %135, %135 : vector<8x32xf32>
    %cst_53 = arith.constant dense<0.000000e+00> : vector<8xf32>
    %137 = vector.multi_reduction <add>, %136, %cst_53 [1] : vector<8x32xf32> to vector<8xf32>
    %138 = vector.shape_cast %137 : vector<8xf32> to vector<8x1xf32>
    %cst_54 = arith.constant 3.200000e+01 : f32
    %139 = vector.broadcast %cst_54 : f32 to vector<8x1xf32>
    %140 = arith.divf %138, %139 : vector<8x1xf32>
    %141 = vector.broadcast %133 : vector<8x1xf32> to vector<8x32xf32>
    %142 = arith.subf %129, %141 : vector<8x32xf32>
    %cst_55 = arith.constant 9.99999997E-7 : f32
    %143 = vector.broadcast %cst_55 : f32 to vector<8x1xf32>
    %144 = arith.addf %140, %143 : vector<8x1xf32>
    %145 = math.rsqrt %144 : vector<8x1xf32>
    %146 = vector.broadcast %145 : vector<8x1xf32> to vector<8x32xf32>
    %147 = arith.mulf %142, %146 : vector<8x32xf32>
    %148 = vector.broadcast %5 : vector<1x32xf32> to vector<8x32xf32>
    %149 = arith.mulf %147, %148 : vector<8x32xf32>
    %150 = vector.broadcast %6 : vector<1x32xf32> to vector<8x32xf32>
    %151 = arith.addf %149, %150 : vector<8x32xf32>
    %152 = arith.truncf %151 : vector<8x32xf32> to vector<8x32xbf16>
    %c0_56 = arith.constant 0 : index
    %c0_57 = arith.constant 0 : index
    %153 = vector.load %arg9[%c0_56, %c0_57] : memref<32x32xbf16, #tpu.memory_space<vmem>>, vector<32x32xbf16>
    %cst_58 = arith.constant dense<0.000000e+00> : vector<8x32xf32>
    %154 = tpu.matmul %152, %153, %cst_58 {dimension_numbers = #tpu.dot_dimension_numbers<[1], [0], [0], [1], [0, 0, 1, 1], [], []>} : vector<8x32xbf16>, vector<32x32xbf16>, vector<8x32xf32> -> vector<8x32xf32>
    %155 = arith.truncf %154 : vector<8x32xf32> to vector<8x32xbf16>
    %c0_59 = arith.constant 0 : index
    %c0_60 = arith.constant 0 : index
    %156 = vector.load %arg10[%c0_59, %c0_60] : memref<32x64xbf16, #tpu.memory_space<vmem>>, vector<32x64xbf16>
    %cst_61 = arith.constant dense<0.000000e+00> : vector<8x64xf32>
    %157 = tpu.matmul %4, %156, %cst_61 {dimension_numbers = #tpu.dot_dimension_numbers<[1], [0], [0], [1], [0, 0, 1, 1], [], []>} : vector<8x32xbf16>, vector<32x64xbf16>, vector<8x64xf32> -> vector<8x64xf32>
    %158 = arith.truncf %157 : vector<8x64xf32> to vector<8x64xbf16>
    %159 = vector.extract_strided_slice %158 {offsets = [0, 0], sizes = [8, 32], strides = [1, 1]} : vector<8x64xbf16> to vector<8x32xbf16>
    %160 = vector.extract_strided_slice %158 {offsets = [0, 32], sizes = [8, 32], strides = [1, 1]} : vector<8x64xbf16> to vector<8x32xbf16>
    %c0_62 = arith.constant 0 : index
    %c0_63 = arith.constant 0 : index
    %161 = vector.load %arg11[%c0_62, %c0_63] : memref<32x32xbf16, #tpu.memory_space<vmem>>, vector<32x32xbf16>
    %162 = vector.extract_strided_slice %155 {offsets = [0, 0], sizes = [8, 8], strides = [1, 1]} : vector<8x32xbf16> to vector<8x8xbf16>
    %163 = vector.extract_strided_slice %159 {offsets = [0, 0], sizes = [8, 8], strides = [1, 1]} : vector<8x32xbf16> to vector<8x8xbf16>
    %cst_64 = arith.constant dense<0.000000e+00> : vector<8x8xf32>
    %164 = tpu.matmul %162, %163, %cst_64 {dimension_numbers = #tpu.dot_dimension_numbers<[1], [1], [0], [0], [0, 0, 1, 0], [], []>} : vector<8x8xbf16>, vector<8x8xbf16>, vector<8x8xf32> -> vector<8x8xf32>
    %165 = vector.broadcast %10 : vector<1x8xf32> to vector<8x8xf32>
    %166 = arith.addf %164, %165 : vector<8x8xf32>
    %cst_65 = arith.constant dense<0xFF800000> : vector<8xf32>
    %167 = vector.multi_reduction <maximumf>, %166, %cst_65 [1] : vector<8x8xf32> to vector<8xf32>
    %168 = vector.shape_cast %167 : vector<8xf32> to vector<8x1xf32>
    %169 = vector.broadcast %168 : vector<8x1xf32> to vector<8x8xf32>
    %170 = arith.subf %166, %169 : vector<8x8xf32>
    %171 = math.exp %170 : vector<8x8xf32>
    %cst_66 = arith.constant dense<0.000000e+00> : vector<8xf32>
    %172 = vector.multi_reduction <add>, %171, %cst_66 [1] : vector<8x8xf32> to vector<8xf32>
    %173 = vector.shape_cast %172 : vector<8xf32> to vector<8x1xf32>
    %174 = tpu.reciprocal %173 {approx = true} : vector<8x1xf32> -> vector<8x1xf32>
    %175 = vector.broadcast %174 : vector<8x1xf32> to vector<8x8xf32>
    %176 = arith.mulf %171, %175 : vector<8x8xf32>
    %177 = arith.truncf %176 : vector<8x8xf32> to vector<8x8xbf16>
    %178 = vector.extract_strided_slice %160 {offsets = [0, 0], sizes = [8, 8], strides = [1, 1]} : vector<8x32xbf16> to vector<8x8xbf16>
    %cst_67 = arith.constant dense<0.000000e+00> : vector<8x8xf32>
    %179 = tpu.matmul %177, %178, %cst_67 {dimension_numbers = #tpu.dot_dimension_numbers<[1], [0], [0], [1], [0, 0, 1, 1], [], []>} : vector<8x8xbf16>, vector<8x8xbf16>, vector<8x8xf32> -> vector<8x8xf32>
    %180 = arith.truncf %179 : vector<8x8xf32> to vector<8x8xbf16>
    %c0_68 = arith.constant 0 : index
    %c0_69 = arith.constant 0 : index
    %181 = vector.load %arg17[%c0_68, %c0_69] : memref<8x32xbf16, #tpu.memory_space<vmem>>, vector<8x8xbf16>
    tpu.vector_store %arg17[%c0_68, %c0_69], %180 {strides = array<i32>} : memref<8x32xbf16, #tpu.memory_space<vmem>>, vector<8x8xbf16>,
    %182 = vector.extract_strided_slice %155 {offsets = [0, 8], sizes = [8, 8], strides = [1, 1]} : vector<8x32xbf16> to vector<8x8xbf16>
    %183 = vector.extract_strided_slice %159 {offsets = [0, 8], sizes = [8, 8], strides = [1, 1]} : vector<8x32xbf16> to vector<8x8xbf16>
    %cst_70 = arith.constant dense<0.000000e+00> : vector<8x8xf32>
    %184 = tpu.matmul %182, %183, %cst_70 {dimension_numbers = #tpu.dot_dimension_numbers<[1], [1], [0], [0], [0, 0, 1, 0], [], []>} : vector<8x8xbf16>, vector<8x8xbf16>, vector<8x8xf32> -> vector<8x8xf32>
    %185 = vector.broadcast %10 : vector<1x8xf32> to vector<8x8xf32>
    %186 = arith.addf %184, %185 : vector<8x8xf32>
    %cst_71 = arith.constant dense<0xFF800000> : vector<8xf32>
    %187 = vector.multi_reduction <maximumf>, %186, %cst_71 [1] : vector<8x8xf32> to vector<8xf32>
    %188 = vector.shape_cast %187 : vector<8xf32> to vector<8x1xf32>
    %189 = vector.broadcast %188 : vector<8x1xf32> to vector<8x8xf32>
    %190 = arith.subf %186, %189 : vector<8x8xf32>
    %191 = math.exp %190 : vector<8x8xf32>
    %cst_72 = arith.constant dense<0.000000e+00> : vector<8xf32>
    %192 = vector.multi_reduction <add>, %191, %cst_72 [1] : vector<8x8xf32> to vector<8xf32>
    %193 = vector.shape_cast %192 : vector<8xf32> to vector<8x1xf32>
    %194 = tpu.reciprocal %193 {approx = true} : vector<8x1xf32> -> vector<8x1xf32>
    %195 = vector.broadcast %194 : vector<8x1xf32> to vector<8x8xf32>
    %196 = arith.mulf %191, %195 : vector<8x8xf32>
    %197 = arith.truncf %196 : vector<8x8xf32> to vector<8x8xbf16>
    %198 = vector.extract_strided_slice %160 {offsets = [0, 8], sizes = [8, 8], strides = [1, 1]} : vector<8x32xbf16> to vector<8x8xbf16>
    %cst_73 = arith.constant dense<0.000000e+00> : vector<8x8xf32>
    %199 = tpu.matmul %197, %198, %cst_73 {dimension_numbers = #tpu.dot_dimension_numbers<[1], [0], [0], [1], [0, 0, 1, 1], [], []>} : vector<8x8xbf16>, vector<8x8xbf16>, vector<8x8xf32> -> vector<8x8xf32>
    %200 = arith.truncf %199 : vector<8x8xf32> to vector<8x8xbf16>
    %c0_74 = arith.constant 0 : index
    %c8_75 = arith.constant 8 : index
    %201 = vector.load %arg17[%c0_74, %c8_75] : memref<8x32xbf16, #tpu.memory_space<vmem>>, vector<8x8xbf16>
    tpu.vector_store %arg17[%c0_74, %c8_75], %200 {strides = array<i32>} : memref<8x32xbf16, #tpu.memory_space<vmem>>, vector<8x8xbf16>,
    %202 = vector.extract_strided_slice %155 {offsets = [0, 16], sizes = [8, 8], strides = [1, 1]} : vector<8x32xbf16> to vector<8x8xbf16>
    %203 = vector.extract_strided_slice %159 {offsets = [0, 16], sizes = [8, 8], strides = [1, 1]} : vector<8x32xbf16> to vector<8x8xbf16>
    %cst_76 = arith.constant dense<0.000000e+00> : vector<8x8xf32>
    %204 = tpu.matmul %202, %203, %cst_76 {dimension_numbers = #tpu.dot_dimension_numbers<[1], [1], [0], [0], [0, 0, 1, 0], [], []>} : vector<8x8xbf16>, vector<8x8xbf16>, vector<8x8xf32> -> vector<8x8xf32>
    %205 = vector.broadcast %10 : vector<1x8xf32> to vector<8x8xf32>
    %206 = arith.addf %204, %205 : vector<8x8xf32>
    %cst_77 = arith.constant dense<0xFF800000> : vector<8xf32>
    %207 = vector.multi_reduction <maximumf>, %206, %cst_77 [1] : vector<8x8xf32> to vector<8xf32>
    %208 = vector.shape_cast %207 : vector<8xf32> to vector<8x1xf32>
    %209 = vector.broadcast %208 : vector<8x1xf32> to vector<8x8xf32>
    %210 = arith.subf %206, %209 : vector<8x8xf32>
    %211 = math.exp %210 : vector<8x8xf32>
    %cst_78 = arith.constant dense<0.000000e+00> : vector<8xf32>
    %212 = vector.multi_reduction <add>, %211, %cst_78 [1] : vector<8x8xf32> to vector<8xf32>
    %213 = vector.shape_cast %212 : vector<8xf32> to vector<8x1xf32>
    %214 = tpu.reciprocal %213 {approx = true} : vector<8x1xf32> -> vector<8x1xf32>
    %215 = vector.broadcast %214 : vector<8x1xf32> to vector<8x8xf32>
    %216 = arith.mulf %211, %215 : vector<8x8xf32>
    %217 = arith.truncf %216 : vector<8x8xf32> to vector<8x8xbf16>
    %218 = vector.extract_strided_slice %160 {offsets = [0, 16], sizes = [8, 8], strides = [1, 1]} : vector<8x32xbf16> to vector<8x8xbf16>
    %cst_79 = arith.constant dense<0.000000e+00> : vector<8x8xf32>
    %219 = tpu.matmul %217, %218, %cst_79 {dimension_numbers = #tpu.dot_dimension_numbers<[1], [0], [0], [1], [0, 0, 1, 1], [], []>} : vector<8x8xbf16>, vector<8x8xbf16>, vector<8x8xf32> -> vector<8x8xf32>
    %220 = arith.truncf %219 : vector<8x8xf32> to vector<8x8xbf16>
    %c0_80 = arith.constant 0 : index
    %c16_81 = arith.constant 16 : index
    %221 = vector.load %arg17[%c0_80, %c16_81] : memref<8x32xbf16, #tpu.memory_space<vmem>>, vector<8x8xbf16>
    tpu.vector_store %arg17[%c0_80, %c16_81], %220 {strides = array<i32>} : memref<8x32xbf16, #tpu.memory_space<vmem>>, vector<8x8xbf16>,
    %222 = vector.extract_strided_slice %155 {offsets = [0, 24], sizes = [8, 8], strides = [1, 1]} : vector<8x32xbf16> to vector<8x8xbf16>
    %223 = vector.extract_strided_slice %159 {offsets = [0, 24], sizes = [8, 8], strides = [1, 1]} : vector<8x32xbf16> to vector<8x8xbf16>
    %cst_82 = arith.constant dense<0.000000e+00> : vector<8x8xf32>
    %224 = tpu.matmul %222, %223, %cst_82 {dimension_numbers = #tpu.dot_dimension_numbers<[1], [1], [0], [0], [0, 0, 1, 0], [], []>} : vector<8x8xbf16>, vector<8x8xbf16>, vector<8x8xf32> -> vector<8x8xf32>
    %225 = vector.broadcast %10 : vector<1x8xf32> to vector<8x8xf32>
    %226 = arith.addf %224, %225 : vector<8x8xf32>
    %cst_83 = arith.constant dense<0xFF800000> : vector<8xf32>
    %227 = vector.multi_reduction <maximumf>, %226, %cst_83 [1] : vector<8x8xf32> to vector<8xf32>
    %228 = vector.shape_cast %227 : vector<8xf32> to vector<8x1xf32>
    %229 = vector.broadcast %228 : vector<8x1xf32> to vector<8x8xf32>
    %230 = arith.subf %226, %229 : vector<8x8xf32>
    %231 = math.exp %230 : vector<8x8xf32>
    %cst_84 = arith.constant dense<0.000000e+00> : vector<8xf32>
    %232 = vector.multi_reduction <add>, %231, %cst_84 [1] : vector<8x8xf32> to vector<8xf32>
    %233 = vector.shape_cast %232 : vector<8xf32> to vector<8x1xf32>
    %234 = tpu.reciprocal %233 {approx = true} : vector<8x1xf32> -> vector<8x1xf32>
    %235 = vector.broadcast %234 : vector<8x1xf32> to vector<8x8xf32>
    %236 = arith.mulf %231, %235 : vector<8x8xf32>
    %237 = arith.truncf %236 : vector<8x8xf32> to vector<8x8xbf16>
    %238 = vector.extract_strided_slice %160 {offsets = [0, 24], sizes = [8, 8], strides = [1, 1]} : vector<8x32xbf16> to vector<8x8xbf16>
    %cst_85 = arith.constant dense<0.000000e+00> : vector<8x8xf32>
    %239 = tpu.matmul %237, %238, %cst_85 {dimension_numbers = #tpu.dot_dimension_numbers<[1], [0], [0], [1], [0, 0, 1, 1], [], []>} : vector<8x8xbf16>, vector<8x8xbf16>, vector<8x8xf32> -> vector<8x8xf32>
    %240 = arith.truncf %239 : vector<8x8xf32> to vector<8x8xbf16>
    %c0_86 = arith.constant 0 : index
    %c24_87 = arith.constant 24 : index
    %241 = vector.load %arg17[%c0_86, %c24_87] : memref<8x32xbf16, #tpu.memory_space<vmem>>, vector<8x8xbf16>
    tpu.vector_store %arg17[%c0_86, %c24_87], %240 {strides = array<i32>} : memref<8x32xbf16, #tpu.memory_space<vmem>>, vector<8x8xbf16>,
    %c0_88 = arith.constant 0 : index
    %c0_89 = arith.constant 0 : index
    %242 = vector.load %arg17[%c0_88, %c0_89] : memref<8x32xbf16, #tpu.memory_space<vmem>>, vector<8x32xbf16>
    %cst_90 = arith.constant dense<0.000000e+00> : vector<8x32xf32>
    %243 = tpu.matmul %242, %161, %cst_90 {dimension_numbers = #tpu.dot_dimension_numbers<[1], [0], [0], [1], [0, 0, 1, 1], [], []>} : vector<8x32xbf16>, vector<32x32xbf16>, vector<8x32xf32> -> vector<8x32xf32>
    %244 = arith.addf %129, %243 : vector<8x32xf32>
    %cst_91 = arith.constant dense<0.000000e+00> : vector<8xf32>
    %245 = vector.multi_reduction <add>, %244, %cst_91 [1] : vector<8x32xf32> to vector<8xf32>
    %246 = vector.shape_cast %245 : vector<8xf32> to vector<8x1xf32>
    %cst_92 = arith.constant 3.200000e+01 : f32
    %247 = vector.broadcast %cst_92 : f32 to vector<8x1xf32>
    %248 = arith.divf %246, %247 : vector<8x1xf32>
    %249 = vector.broadcast %248 : vector<8x1xf32> to vector<8x32xf32>
    %250 = arith.subf %244, %249 : vector<8x32xf32>
    %251 = arith.mulf %250, %250 : vector<8x32xf32>
    %cst_93 = arith.constant dense<0.000000e+00> : vector<8xf32>
    %252 = vector.multi_reduction <add>, %251, %cst_93 [1] : vector<8x32xf32> to vector<8xf32>
    %253 = vector.shape_cast %252 : vector<8xf32> to vector<8x1xf32>
    %cst_94 = arith.constant 3.200000e+01 : f32
    %254 = vector.broadcast %cst_94 : f32 to vector<8x1xf32>
    %255 = arith.divf %253, %254 : vector<8x1xf32>
    %256 = vector.broadcast %248 : vector<8x1xf32> to vector<8x32xf32>
    %257 = arith.subf %244, %256 : vector<8x32xf32>
    %cst_95 = arith.constant 9.99999997E-7 : f32
    %258 = vector.broadcast %cst_95 : f32 to vector<8x1xf32>
    %259 = arith.addf %255, %258 : vector<8x1xf32>
    %260 = math.rsqrt %259 : vector<8x1xf32>
    %261 = vector.broadcast %260 : vector<8x1xf32> to vector<8x32xf32>
    %262 = arith.mulf %257, %261 : vector<8x32xf32>
    %263 = vector.broadcast %5 : vector<1x32xf32> to vector<8x32xf32>
    %264 = arith.mulf %262, %263 : vector<8x32xf32>
    %265 = vector.broadcast %6 : vector<1x32xf32> to vector<8x32xf32>
    %266 = arith.addf %264, %265 : vector<8x32xf32>
    %267 = arith.truncf %266 : vector<8x32xf32> to vector<8x32xbf16>
    %c0_96 = arith.constant 0 : index
    %c0_97 = arith.constant 0 : index
    %268 = vector.load %arg12[%c0_96, %c0_97] : memref<32x64xbf16, #tpu.memory_space<vmem>>, vector<32x64xbf16>
    %cst_98 = arith.constant dense<0.000000e+00> : vector<8x64xf32>
    %269 = tpu.matmul %267, %268, %cst_98 {dimension_numbers = #tpu.dot_dimension_numbers<[1], [0], [0], [1], [0, 0, 1, 1], [], []>} : vector<8x32xbf16>, vector<32x64xbf16>, vector<8x64xf32> -> vector<8x64xf32>
    %c0_99 = arith.constant 0 : index
    %c0_100 = arith.constant 0 : index
    %270 = vector.load %arg13[%c0_99, %c0_100] : memref<1x64xf32, #tpu.memory_space<vmem>>, vector<1x64xf32>
    %271 = vector.broadcast %270 : vector<1x64xf32> to vector<8x64xf32>
    %272 = arith.addf %269, %271 : vector<8x64xf32>
    %cst_101 = arith.constant 0.000000e+00 : f32
    %273 = vector.broadcast %cst_101 : f32 to vector<8x64xf32>
    %274 = arith.maximumf %272, %273 : vector<8x64xf32>
    %275 = arith.truncf %274 : vector<8x64xf32> to vector<8x64xbf16>
    %c0_102 = arith.constant 0 : index
    %c0_103 = arith.constant 0 : index
    %276 = vector.load %arg14[%c0_102, %c0_103] : memref<64x32xbf16, #tpu.memory_space<vmem>>, vector<64x32xbf16>
    %cst_104 = arith.constant dense<0.000000e+00> : vector<8x32xf32>
    %277 = tpu.matmul %275, %276, %cst_104 {dimension_numbers = #tpu.dot_dimension_numbers<[1], [0], [0], [1], [0, 0, 1, 1], [], []>} : vector<8x64xbf16>, vector<64x32xbf16>, vector<8x32xf32> -> vector<8x32xf32>
    %c0_105 = arith.constant 0 : index
    %c0_106 = arith.constant 0 : index
    %278 = vector.load %arg15[%c0_105, %c0_106] : memref<1x32xf32, #tpu.memory_space<vmem>>, vector<1x32xf32>
    %279 = vector.broadcast %278 : vector<1x32xf32> to vector<8x32xf32>
    %280 = arith.addf %277, %279 : vector<8x32xf32>
    %281 = arith.addf %244, %280 : vector<8x32xf32>
    %282 = arith.truncf %281 : vector<8x32xf32> to vector<8x32xbf16>
    %c0_107 = arith.constant 0 : index
    %c0_108 = arith.constant 0 : index
    %c0_109 = arith.constant 0 : index
    %283 = vector.load %arg16[%c0_107, %c0_108, %c0_109] : memref<1x8x32xbf16, #tpu.memory_space<vmem>>, vector<1x8x32xbf16>
    %284 = vector.shape_cast %283 : vector<1x8x32xbf16> to vector<8x32xbf16>
    %285 = vector.shape_cast %282 : vector<8x32xbf16> to vector<1x8x32xbf16>
    tpu.vector_store %arg16[%c0_107, %c0_108, %c0_109], %285 {strides = array<i32>} : memref<1x8x32xbf16, #tpu.memory_space<vmem>>, vector<1x8x32xbf16>,
    return
  }
  func.func @transform_0(%arg0: i32) -> (i32, i32, i32) {
    %c0_i32 = arith.constant 0 : i32
    %c0_i32_0 = arith.constant 0 : i32
    %c0_i32_1 = arith.constant 0 : i32
    return %arg0, %c0_i32, %c0_i32_0 : i32, i32, i32
  }
  func.func @transform_1(%arg0: i32) -> (i32, i32, i32) {
    %c0_i32 = arith.constant 0 : i32
    %c0_i32_0 = arith.constant 0 : i32
    %c0_i32_1 = arith.constant 0 : i32
    return %arg0, %c0_i32, %c0_i32_0 : i32, i32, i32
  }
  func.func @transform_2(%arg0: i32) -> (i32, i32, i32) {
    %c0_i32 = arith.constant 0 : i32
    %c0_i32_0 = arith.constant 0 : i32
    %c0_i32_1 = arith.constant 0 : i32
    return %arg0, %c0_i32, %c0_i32_0 : i32, i32, i32
  }
  func.func @transform_3(%arg0: i32) -> (i32, i32, i32) {
    %c0_i32 = arith.constant 0 : i32
    %c0_i32_0 = arith.constant 0 : i32
    %c0_i32_1 = arith.constant 0 : i32
    return %arg0, %c0_i32, %c0_i32_0 : i32, i32, i32
  }
  func.func @transform_4(%arg0: i32) -> (i32, i32) {
    %c0_i32 = arith.constant 0 : i32
    %c0_i32_0 = arith.constant 0 : i32
    %c0_i32_1 = arith.constant 0 : i32
    return %c0_i32, %c0_i32_0 : i32, i32
  }
  func.func @transform_5(%arg0: i32) -> (i32, i32) {
    %c0_i32 = arith.constant 0 : i32
    %c0_i32_0 = arith.constant 0 : i32
    %c0_i32_1 = arith.constant 0 : i32
    return %c0_i32, %c0_i32_0 : i32, i32
  }
  func.func @transform_6(%arg0: i32) -> (i32, i32) {
    %c0_i32 = arith.constant 0 : i32
    %c0_i32_0 = arith.constant 0 : i32
    %c0_i32_1 = arith.constant 0 : i32
    return %c0_i32, %c0_i32_0 : i32, i32
  }
  func.func @transform_7(%arg0: i32) -> (i32, i32) {
    %c0_i32 = arith.constant 0 : i32
    %c0_i32_0 = arith.constant 0 : i32
    %c0_i32_1 = arith.constant 0 : i32
    return %c0_i32, %c0_i32_0 : i32, i32
  }
  func.func @transform_8(%arg0: i32) -> (i32, i32) {
    %c0_i32 = arith.constant 0 : i32
    %c0_i32_0 = arith.constant 0 : i32
    %c0_i32_1 = arith.constant 0 : i32
    return %c0_i32, %c0_i32_0 : i32, i32
  }
  func.func @transform_9(%arg0: i32) -> (i32, i32) {
    %c0_i32 = arith.constant 0 : i32
    %c0_i32_0 = arith.constant 0 : i32
    %c0_i32_1 = arith.constant 0 : i32
    return %c0_i32, %c0_i32_0 : i32, i32
  }
  func.func @transform_10(%arg0: i32) -> (i32, i32) {
    %c0_i32 = arith.constant 0 : i32
    %c0_i32_0 = arith.constant 0 : i32
    %c0_i32_1 = arith.constant 0 : i32
    return %c0_i32, %c0_i32_0 : i32, i32
  }
  func.func @transform_11(%arg0: i32) -> (i32, i32) {
    %c0_i32 = arith.constant 0 : i32
    %c0_i32_0 = arith.constant 0 : i32
    %c0_i32_1 = arith.constant 0 : i32
    return %c0_i32, %c0_i32_0 : i32, i32
  }
  func.func @transform_12(%arg0: i32) -> (i32, i32) {
    %c0_i32 = arith.constant 0 : i32
    %c0_i32_0 = arith.constant 0 : i32
    %c0_i32_1 = arith.constant 0 : i32
    return %c0_i32, %c0_i32_0 : i32, i32
  }
  func.func @transform_13(%arg0: i32) -> (i32, i32) {
    %c0_i32 = arith.constant 0 : i32
    %c0_i32_0 = arith.constant 0 : i32
    %c0_i32_1 = arith.constant 0 : i32
    return %c0_i32, %c0_i32_0 : i32, i32
  }
  func.func @transform_14(%arg0: i32) -> (i32, i32) {
    %c0_i32 = arith.constant 0 : i32
    %c0_i32_0 = arith.constant 0 : i32
    %c0_i32_1 = arith.constant 0 : i32
    return %c0_i32, %c0_i32_0 : i32, i32
  }
  func.func @transform_15(%arg0: i32) -> (i32, i32, i32) {
    %c0_i32 = arith.constant 0 : i32
    %c0_i32_0 = arith.constant 0 : i32
    %c0_i32_1 = arith.constant 0 : i32
    return %arg0, %c0_i32, %c0_i32_0 : i32, i32, i32
  }
}

</mosaic_0001>

<bundles_post_ra>
// kernel: tpu_custom_call.1
= control target key start
LH: loop header
LB: loop body
LE: loop exit
PB: predicated region body
PF: predicated region fallthrough
CT: control target
= control target key end

     0   :  { %s3772_s0 = inlined_call_operand.hbm [shape: bf16[2,8,32], index: 0, kind: input, shape index: {}]   ;;  %s3773_s1 = inlined_call_operand.hbm [shape: bf16[2,8,32], index: 1, kind: input, shape index: {}]   ;;  %s3774_s2 = inlined_call_operand.hbm [shape: f32[2,1,8], index: 2, kind: input, shape index: {}]   ;;  %s3775_s3 = inlined_call_operand.hbm [shape: f32[2,1,8], index: 3, kind: input, shape index: {}]   ;;  %s3776_s4 = inlined_call_operand.hbm [shape: f32[1,32], index: 4, kind: input, shape index: {}]   ;;  %s3777_s5 = inlined_call_operand.hbm [shape: f32[1,32], index: 5, kind: input, shape index: {}]   ;;  %s3778_s6 = inlined_call_operand.vmem [shape: bf16[32,96], index: 6, kind: input, shape index: {}]   ;;  %s3779_s7 = inlined_call_operand.vmem [shape: bf16[32,32], index: 7, kind: input, shape index: {}]   ;;  %s3780_s8 = inlined_call_operand.vmem [shape: bf16[32,32], index: 8, kind: input, shape index: {}]   ;;  %s3781_s9 = inlined_call_operand.vmem [shape: bf16[32,64], index: 9, kind: input, shape index: {}]   ;;  %s3782_s10 = inlined_call_operand.hbm [shape: bf16[32,32], index: 10, kind: input, shape index: {}]   ;;  %s3783_s11 = inlined_call_operand.hbm [shape: bf16[32,64], index: 11, kind: input, shape index: {}]   ;;  %s3784_s12 = inlined_call_operand.vmem [shape: f32[1,64], index: 12, kind: input, shape index: {}]   ;;  %s3785_s13 = inlined_call_operand.vmem [shape: bf16[64,32], index: 13, kind: input, shape index: {}]   ;;  %s3786_s14 = inlined_call_operand.vmem [shape: f32[1,32], index: 14, kind: input, shape index: {}]   ;;  %s3787_s15 = inlined_call_operand.hbm [shape: bf16[2,8,32], index: 15, kind: output, shape index: {}]  }
   0x1   :  { %3809 = sst [smem:[#allocation31_spill]] %s3773_s1 }
   0x2   :  { %3810 = sst [smem:[#allocation32_spill]] %s3776_s4 }
   0x3   :  { %3811 = sst [smem:[#allocation33_spill]] %s3777_s5 }
   0x4   :  { %3812 = sst [smem:[#allocation34_spill]] %s3780_s8 }
   0x5   :  { %3813 = sst [smem:[#allocation35_spill]] %s3782_s10 }
   0x6   :  { %3814 = sst [smem:[#allocation36_spill]] %s3784_s12 }
   0x7   :  { %3815 = sst [smem:[#allocation37_spill]] %s3785_s13 }
   0x8   :  { %3816 = sst [smem:[#allocation38_spill]] %s3786_s14 }
   0x9   :  { %3817 = sst [smem:[#allocation39_spill]] %s3787_s15 }
   0xa   :  { %20 = vsyncpa [#allocation4], 0 }
   0xb   :  { %22 = vsyncpa [#allocation4 + $0x1], 0 }
   0xc   :  { %23 = vsyncpa [#allocation7], 0 }
   0xd   :  { %25 = vsyncpa [#allocation7 + $0x1], 0 }
   0xe   :  { %26 = vsyncpa [#allocation10], 0 }
   0xf   :  { %28 = vsyncpa [#allocation10 + $0x1], 0 }
  0x10   :  { %29 = vsyncpa [#allocation13], 0 }
  0x11   :  { %30 = vsyncpa [#allocation16], 0 }
  0x12   :  { %31 = vsyncpa [#allocation5], 0 }
  0x13   :  { %33 = vsyncpa [#allocation5 + $0x1], 0  ;;  %s3206_s18 = smov 0   ;;  %s3208_s19 = smov 0  }
  0x14   :  { %s3210_s20 = smov 0   ;;  %s3212_s21 = smov 0  }
  0x15 LB: > { %3818 = sst [smem:[#allocation25_spill]] %s3085_s18  ;;  %s3227_s22 = sadd.s32 4294967295, %s3097_s21   ;;  %s3097_s21 = sphi %s3212_s21, %s3863_s21   ;;  %s3093_s20 = sphi %s3210_s20, %s3865_s20   ;;  %s3089_s19 = sphi %s3208_s19, %s3867_s19   ;;  %s3085_s18 = sphi %s3206_s18, %s3866_s18  }
  0x16   : > { %3819 = sst [smem:[#allocation26_spill]] %s3093_s20  ;;  %s2330_s23 = sadd.s32 4294967294, %s3097_s21  }
  0x17   : > { %p59_p0 = scmp.ne.s32.totalorder %s3089_s19, %s3085_s18  ;;  %p3792_p1 = scmp.eq.s32.totalorder %s3227_s22, 0 }
  0x18   : > { %p398_p3 = scmp.eq.s32.totalorder %s2330_s23, 1  ;;  %p2331_p5 = scmp.ge.s32.totalorder %s3097_s21, 1 }
  0x19   : > { %p3236_p4 = por %p3792_p1, %p59_p0  ;;  %p405_p7 = scmp.lt.s32.totalorder %s3097_s21, 3 }
  0x1a   : > { %p3241_p6 = por %p398_p3, %p59_p0  ;;  %s3099_s27 = smov [#allocation11]  }
  0x1b   : > { %s3820_s24 = scalar_select %p3236_p4, 1, 0 }
  0x1c   : > { %s3821_s25 = scalar_select %p3241_p6, 1, 0 }
  0x1d   : > { %p3246_p8 = pnand %p2331_p5, %p405_p7  ;;  %s418_s28 = sshll.u32 %s3099_s27, 4  ;;  %s419_s28 = int_to_ptr.vmem [resolvable:$true] %s418_s28 }
  0x1e   : > { %3822 = sst [smem:[#allocation27_spill]] %s3821_s25  ;;  %s3100_s29 = smov [#allocation12]  }
  0x1f   : > { %s3823_s26 = scalar_select %p3246_p8, 1, 0 }
  0x20   : > { %p2649_p10 = pneg %p3246_p8  ;;  %s429_s30 = sshll.u32 %s3100_s29, 4  ;;  %s430_s30 = int_to_ptr.vmem [resolvable:$true] %s429_s30 }
  0x21   : > { %s3260_s17 = sadd.s32 1, %s3097_s21   ;;  %s2808_s27 = scalar_lea.vmem %s419_s28, 16 }
  0x22   : > { %p3255_p11 = pnand %p2649_p10, %p3792_p1  ;;  %3825 = sst [smem:[#allocation28_spill]] %s3260_s17 }
  0x23   : > { %s43_s23 = ssub.s32 %s3097_s21, %s3260_s17  ;;  %p2809_p13 = scmp.ne.s32.totalorder %s419_s28, %s2808_s27 }
  0x24   : > { %s3824_s16 = scalar_select %p3255_p11, 1, 0 }
  0x25   : > { %p3801_p12 = pneg %p3255_p11  ;;  %s2815_s29 = scalar_lea.vmem %s419_s28, 32 }
  0x26   : > { %p2816_p5 = scmp.lt.s32.totalorder %s419_s28, %s419_s28  ;;  %p2817_p7 = scmp.lt.s32.totalorder %s2815_s29, %s2808_s27 }
  0x27   : > { %p2811_p0 = pnand %p2809_p13, %p3801_p12 }
  0x28   : > { %p2818_p10 = por %p2817_p7, %p2816_p5 }
  0x29   : > { %p2812_p3 = pneg %p2811_p0 }
  0x2b   : > { %p2819_p9 = pnand %p2818_p10, %p2812_p3 }
  0x2d   : > { %2822 = shalt.err (!%p2819_p9)
}
  0x2e   : > { %s3826_s4 = sld [smem:[#allocation32_spill]]  ;;  %s2834_s17 = scalar_lea.vmem %s430_s30, 16 }
  0x2f   : > { %p2835_p1 = scmp.ne.s32.totalorder %s430_s30, %s2834_s17  ;;  %s2841_s15 = scalar_lea.vmem %s430_s30, 32 }
  0x30   : > { %p2842_p0 = scmp.lt.s32.totalorder %s430_s30, %s430_s30  ;;  %p2843_p6 = scmp.lt.s32.totalorder %s2841_s15, %s2834_s17 }
  0x31   : > { %p2837_p2 = pnand %p2835_p1, %p3801_p12 }
  0x32   : > { %p2844_p4 = por %p2843_p6, %p2842_p0 }
  0x33   : > { %p2838_p13 = pneg %p2837_p2 }
  0x34   : > { %2652 = dma.hbm_to_vmem [thread:$0]  (!%p3255_p11), %s3826_s4, 16, %s419_s28, [#allocation10]  }
  0x35   : > { %p2845_p5 = pnand %p2844_p4, %p2838_p13 }
  0x37   : > { %2848 = shalt.err (!%p2845_p5)
}
  0x38   : > { %s3827_s5 = sld [smem:[#allocation33_spill]]  ;;  %p44_p1 = scmp.eq.s32.totalorder %s43_s23, 0 }
  0x39   : > { %s46_s15 = sadd.s32 1, %s3093_s20  ;;  %p53_p2 = scmp.ne.s32.totalorder %s3093_s20, %s3089_s19 }
  0x3a   : > { %p54_p4 = scmp.eq.s32.totalorder %s3097_s21, 0  ;;  %p3829_p9 = scmp.eq.s32.totalorder %s3227_s22, 1 }
  0x3b   : > { %s3287_s18 = scalar_select %p44_p1, %s3093_s20, %s46_s15  }
  0x3c   : > { %p55_p6 = por %p54_p4, %p53_p2  ;;  %p3291_p3 = por %p3829_p9, %p53_p2 }
  0x3d   : > { %3828 = sst [smem:[#allocation29_spill]] %s3287_s18  ;;  %p2683_p7 = scmp.lt.s32.totalorder %s3097_s21, 2 }
  0x3e   : > { %2655 = dma.hbm_to_vmem [thread:$0]  (!%p3255_p11), %s3827_s5, 16, %s430_s30, [#allocation13]  }
  0x3f   : > { %s3830_s25 = scalar_select %p3291_p3, 1, 0 }
  0x40   : > { %s3297_s28 = sand.u32 1, %s3093_s20   ;;  %s3799_s30 = sshll.u32 %s3097_s21, 6 }
  0x41   : > { %3831 = sst [smem:[#allocation30_spill]] %s3830_s25  ;;  %s3798_s17 = sshll.u32 %s3297_s28, 2 }
  0x42   : > { %p3301_p10 = pnand %p2683_p7, %p55_p6  ;;  %s3800_s27 = sand.u32 1, %s3097_s21  }
  0x43   : > { %s3833_s1 = sld [smem:[#allocation31_spill]]  ;;  %s509_s5 = scalar_lea.vmem [#allocation6], %s3798_s17 }
  0x44   : > { %s516_s18 = sshll.u32 %s509_s5, 4  ;;  %s3317_s20 = scalar_lea.sflag [#allocation7], %s3800_s27  ;;  %s517_s18 = int_to_ptr.vmem [resolvable:$true] %s516_s18 }
  0x45   : > { %p3323_p0 = pneg %p3301_p10 }
  0x49   : > { %s3311_s4 = scalar_lea.hbm %s3833_s1, %s3799_s30  ;;  %s2854_s17 = scalar_lea.hbm %s3833_s1, 128 }
  0x4a   : > { %s2849_s25 = scalar_lea.hbm %s3311_s4, 64  ;;  %p2855_p2 = scmp.lt.s32.totalorder %s3311_s4, %s3833_s1 }
  0x4b   : > { %p2850_p13 = scmp.ne.s32.totalorder %s3311_s4, %s2849_s25  ;;  %p2856_p4 = scmp.lt.s32.totalorder %s2854_s17, %s2849_s25 }
  0x4d   : > { %p2852_p5 = pnand %p3323_p0, %p2850_p13  ;;  %p2857_p6 = por %p2856_p4, %p2855_p2 }
  0x4f   : > { %p2853_p1 = pneg %p2852_p5 }
  0x51   : > { %p2858_p9 = pnand %p2857_p6, %p2853_p1 }
  0x53   : > { %2861 = shalt.err (!%p2858_p9)
}
  0x54   : > { %s2862_s27 = scalar_lea.vmem %s517_s18, 64  ;;  %s3101_s12 = smov [#allocation6]  }
  0x55   : > { %p2863_p7 = scmp.ne.s32.totalorder %s517_s18, %s2862_s27  ;;  %s2867_s13 = sshll.u32 %s3101_s12, 4  ;;  %s2868_s13 = int_to_ptr.vmem [resolvable:$false] %s2867_s13 }
  0x56   : > { %s2869_s8 = scalar_lea.vmem %s2868_s13, 128  ;;  %p2870_p13 = scmp.lt.s32.totalorder %s517_s18, %s2868_s13 }
  0x57   : > { %p2865_p12 = pnand %p2863_p7, %p3323_p0  ;;  %p2871_p5 = scmp.lt.s32.totalorder %s2869_s8, %s2862_s27 }
  0x59   : > { %p2866_p3 = pneg %p2865_p12  ;;  %p2872_p8 = por %p2871_p5, %p2870_p13 }
  0x5b   : > { %p2873_p11 = pnand %p2872_p8, %p2866_p3 }
  0x5d   : > { %2876 = shalt.err (!%p2873_p11)
}
  0x5e   : > { %2668 = dma.hbm_to_vmem [thread:$0]  (!%p3301_p10), %s3311_s4, 64, %s517_s18, %s3317_s20  }
  0x5f   : > { %s3102_s25 = smov [#allocation14]   ;;  %p3835_p1 = scmp.ne.s32.totalorder %s3824_s16, 0 }
  0x60   : > { %s451_s17 = sshll.u32 %s3102_s25, 4  ;;  %s452_s17 = int_to_ptr.vmem [resolvable:$true] %s451_s17 }
  0x61   : > { %s2888_s30 = scalar_lea.vmem %s452_s17, 256  ;;  %p3836_p2 = pneg %p3835_p1 }
  0x62   : > { %p2889_p12 = scmp.ne.s32.totalorder %s452_s17, %s2888_s30  ;;  %p2896_p9 = scmp.lt.s32.totalorder %s452_s17, %s452_s17 }
  0x63   : > { %p2897_p7 = scmp.lt.s32.totalorder %s2888_s30, %s2888_s30 }
  0x64   : > { %p2891_p4 = pnand %p2889_p12, %p3836_p2 }
  0x65   : > { %p2898_p13 = por %p2897_p7, %p2896_p9 }
  0x66   : > { %p2892_p6 = pneg %p2891_p4 }
  0x68   : > { %p2899_p8 = pnand %p2898_p13, %p2892_p6 }
  0x6a   : > { %2902 = shalt.err (!%p2899_p8)
}
  0x6b   : > { %s3103_s8 = smov 64   ;;  %s3104_s12 = smov 4  }
  0x6c   : > { %s3837_s10 = sld [smem:[#allocation35_spill]]  ;;  %s3105_s18 = smov [#allocation15]  }
  0x6d   : > { %s464_s27 = sshll.u32 %s3105_s18, 4  ;;  %s3838_s29 = sshll.u32 %s3097_s21, 6  ;;  %s465_s27 = int_to_ptr.vmem [resolvable:$true] %s464_s27 }
  0x6e   : > { %s3355_s25 = scalar_lea.hbm %s3772_s0, %s3838_s29  ;;  %s2914_s30 = scalar_lea.vmem %s465_s27, 256 }
  0x6f   : > { %p2915_p11 = scmp.ne.s32.totalorder %s465_s27, %s2914_s30  ;;  %p3839_p3 = pmov %p3836_p2 }
  0x70   : > { %p2922_p2 = scmp.lt.s32.totalorder %s465_s27, %s465_s27  ;;  %p2923_p4 = scmp.lt.s32.totalorder %s2914_s30, %s2914_s30 }
  0x71   : > { %p2917_p5 = pnand %p2915_p11, %p3839_p3 }
  0x72   : > { %2658 = dma.hbm_to_vmem [thread:$0]  (!%p3835_p1), %s3837_s10, 256, %s452_s17, [#allocation13], %s3103_s8, %s3103_s8, %s3104_s12  }
  0x73   : > { %p2918_p12 = pneg %p2917_p5  ;;  %p2924_p6 = por %p2923_p4, %p2922_p2 }
  0x75   : > { %p2925_p9 = pnand %p2924_p6, %p2918_p12 }
  0x77   : > { %2928 = shalt.err (!%p2925_p9)
}
  0x78   : > { %2661 = dma.hbm_to_vmem [thread:$0]  (!%p3835_p1), %s3783_s11, 256, %s465_s27, [#allocation16], %s3103_s8, %s3103_s8, %s3104_s12  }
  0x79   : > { %s3840_s13 = sshll.u32 %s3297_s28, 2  ;;  %s2341_s15 = sshll.u32 %s3097_s21, 4 }
  0x7a   : > { %s491_s18 = scalar_lea.vmem [#allocation3], %s3840_s13  ;;  %s488_s5 = scalar_lea.sflag [#allocation4], %s3297_s28 }
  0x7b   : > { %s498_s29 = sshll.u32 %s491_s18, 4  ;;  %s2929_s30 = scalar_lea.hbm %s3355_s25, 64  ;;  %s499_s29 = int_to_ptr.vmem [resolvable:$true] %s498_s29 }
  0x7c   : > { %p2930_p7 = scmp.ne.s32.totalorder %s3355_s25, %s2929_s30  ;;  %s2934_s4 = scalar_lea.hbm %s3772_s0, 128 }
  0x7d   : > { %p2935_p11 = scmp.lt.s32.totalorder %s3355_s25, %s3772_s0  ;;  %p2936_p1 = scmp.lt.s32.totalorder %s2934_s4, %s2929_s30 }
  0x7e   : > { %p2932_p13 = pnand %p2930_p7, %p3323_p0 }
  0x7f   : > { %p2937_p3 = por %p2936_p1, %p2935_p11 }
  0x80   : > { %p2933_p8 = pneg %p2932_p13 }
  0x82   : > { %p2938_p5 = pnand %p2937_p3, %p2933_p8 }
  0x84   : > { %2941 = shalt.err (!%p2938_p5)
}
  0x85   : > { %s2942_s8 = scalar_lea.vmem %s499_s29, 64  ;;  %s3106_s12 = smov [#allocation3]  }
  0x86   : > { %p2943_p12 = scmp.ne.s32.totalorder %s499_s29, %s2942_s8  ;;  %s2947_s27 = sshll.u32 %s3106_s12, 4  ;;  %s2948_s27 = int_to_ptr.vmem [resolvable:$false] %s2947_s27 }
  0x87   : > { %s2949_s13 = scalar_lea.vmem %s2948_s27, 128  ;;  %p2950_p6 = scmp.lt.s32.totalorder %s499_s29, %s2948_s27 }
  0x88   : > { %p2945_p2 = pnand %p2943_p12, %p3323_p0  ;;  %p2951_p9 = scmp.lt.s32.totalorder %s2949_s13, %s2942_s8 }
  0x8a   : > { %p2946_p4 = pneg %p2945_p2  ;;  %p2952_p7 = por %p2951_p9, %p2950_p6 }
  0x8c   : > { %p2953_p13 = pnand %p2952_p7, %p2946_p4 }
  0x8e   : > { %2956 = shalt.err (!%p2953_p13)
}
  0x8f   : > { %2665 = dma.hbm_to_vmem [thread:$0]  (!%p3301_p10), %s3355_s25, 64, %s499_s29, %s488_s5  }
  0x90   : > { %s531_s18 = scalar_lea.hbm %s3774_s2, %s2341_s15  ;;  %s526_s30 = scalar_lea.vmem [#allocation8], %s3297_s28 }
  0x91   : > { %s533_s16 = sshll.u32 %s526_s30, 4  ;;  %s2957_s17 = scalar_lea.hbm %s531_s18, 16  ;;  %s534_s16 = int_to_ptr.vmem [resolvable:$true] %s533_s16 }
  0x92   : > { %p2958_p8 = scmp.ne.s32.totalorder %s531_s18, %s2957_s17  ;;  %s2962_s12 = scalar_lea.hbm %s3774_s2, 32 }
  0x93   : > { %p2963_p3 = scmp.lt.s32.totalorder %s531_s18, %s3774_s2  ;;  %p2964_p5 = scmp.lt.s32.totalorder %s2962_s12, %s2957_s17 }
  0x94   : > { %p2960_p11 = pnand %p2958_p8, %p3323_p0 }
  0x95   : > { %p2965_p12 = por %p2964_p5, %p2963_p3 }
  0x96   : > { %p2961_p1 = pneg %p2960_p11 }
  0x98   : > { %p2966_p2 = pnand %p2965_p12, %p2961_p1 }
  0x9a   : > { %2969 = shalt.err (!%p2966_p2)
}
  0x9b   : > { %s2970_s25 = scalar_lea.vmem %s534_s16, 16  ;;  %s3107_s29 = smov [#allocation8]  }
  0x9c   : > { %p2971_p4 = scmp.ne.s32.totalorder %s534_s16, %s2970_s25  ;;  %s2975_s5 = sshll.u32 %s3107_s29, 4  ;;  %s2976_s5 = int_to_ptr.vmem [resolvable:$false] %s2975_s5 }
  0x9d   : > { %s2977_s1 = scalar_lea.vmem %s2976_s5, 32  ;;  %p2978_p7 = scmp.lt.s32.totalorder %s534_s16, %s2976_s5 }
  0x9e   : > { %p2973_p6 = pnand %p2971_p4, %p3323_p0  ;;  %p2979_p13 = scmp.lt.s32.totalorder %s2977_s1, %s2970_s25 }
  0xa0   : > { %p2974_p9 = pneg %p2973_p6  ;;  %p2980_p8 = por %p2979_p13, %p2978_p7 }
  0xa2   : > { %p2981_p11 = pnand %p2980_p8, %p2974_p9 }
  0xa4   : > { %2984 = shalt.err (!%p2981_p11)
}
  0xa5   : > { %2671 = dma.hbm_to_vmem [thread:$0]  (!%p3301_p10), %s531_s18, 16, %s534_s16, %s3317_s20  }
  0xa6   : > { %s3409_s17 = scalar_lea.hbm %s3775_s3, %s2341_s15  ;;  %s543_s4 = scalar_lea.vmem [#allocation9], %s3297_s28 }
  0xa7   : > { %s550_s8 = sshll.u32 %s543_s4, 4  ;;  %s3841_s12 = sand.u32 1, %s3097_s21   ;;  %s551_s8 = int_to_ptr.vmem [resolvable:$true] %s550_s8 }
  0xa8   : > { %s541_s27 = scalar_lea.sflag [#allocation10], %s3841_s12  ;;  %s2985_s13 = scalar_lea.hbm %s3409_s17, 16 }
  0xa9   : > { %p2986_p1 = scmp.ne.s32.totalorder %s3409_s17, %s2985_s13  ;;  %s2990_s16 = scalar_lea.hbm %s3775_s3, 32 }
  0xaa   : > { %p2991_p12 = scmp.lt.s32.totalorder %s3409_s17, %s3775_s3  ;;  %p2992_p2 = scmp.lt.s32.totalorder %s2990_s16, %s2985_s13 }
  0xab   : > { %p2988_p3 = pnand %p2986_p1, %p3323_p0 }
  0xac   : > { %p2993_p4 = por %p2992_p2, %p2991_p12 }
  0xad   : > { %p2989_p5 = pneg %p2988_p3 }
  0xaf   : > { %p2994_p6 = pnand %p2993_p4, %p2989_p5 }
  0xb1   : > { %2997 = shalt.err (!%p2994_p6)
}
  0xb2   : > { %s2998_s28 = scalar_lea.vmem %s551_s8, 16  ;;  %s3108_s29 = smov [#allocation9]  }
  0xb3   : > { %p2999_p9 = scmp.ne.s32.totalorder %s551_s8, %s2998_s28  ;;  %s3003_s5 = sshll.u32 %s3108_s29, 4  ;;  %s3004_s5 = int_to_ptr.vmem [resolvable:$false] %s3003_s5 }
  0xb4   : > { %s3005_s1 = scalar_lea.vmem %s3004_s5, 32  ;;  %p3006_p8 = scmp.lt.s32.totalorder %s551_s8, %s3004_s5 }
  0xb5   : > { %p3001_p7 = pnand %p2999_p9, %p3323_p0  ;;  %p3007_p11 = scmp.lt.s32.totalorder %s3005_s1, %s2998_s28 }
  0xb7   : > { %p3002_p13 = pneg %p3001_p7  ;;  %p3008_p1 = por %p3007_p11, %p3006_p8 }
  0xb9   : > { %p3009_p3 = pnand %p3008_p1, %p3002_p13 }
  0xbb   : > { %3012 = shalt.err (!%p3009_p3)
}
  0xbc   : > { %2674 = dma.hbm_to_vmem [thread:$0]  (!%p3301_p10), %s3409_s17, 16, %s551_s8, %s541_s27  }
  0xbd   : > { %p3842_p5 = scmp.ne.s32.totalorder %s3823_s26, 0 }
  0xbe   : > { %s3433_s14 = sand.u32 (!%p3842_p5), 1, %s3089_s19   ;;  %p3843_p0 = scmp.ne.s32.totalorder (!%p3842_p5), %s3820_s24, 0 }
  0xbf   : > { %559 = sbr.rel (%p3842_p5) target bundleno = 4342 (0x10f6), region = 80  ;;  %s3436_s10 = sshll.u32 (!%p3842_p5), %s3433_s14, 2 }
  0xc0   : > { %s562_s30 = scalar_lea.sflag (!%p3842_p5), [#allocation4], %s3433_s14  ;;  %s565_s4 = scalar_lea.vmem (!%p3842_p5), [#allocation3], %s3436_s10 }
  0xc4   : > { %3056 = dma.done.wait (%p3843_p0), %s562_s30, 64  }
  0xc5   : > { %3058 = vsyncadd (%p3843_p0), %s562_s30, 4294967232  ;;  %s570_s26 = sand.u32 1, %s3227_s22   ;;  %s574_s17 = scalar_lea.vmem [#allocation6], %s3436_s10 }
  0xc6   : > { %s571_s23 = scalar_lea.sflag [#allocation7], %s570_s26 }
  0xc7   : > { %3060 = dma.done.wait (%p3843_p0), %s571_s23, 80  }
  0xc8   : > { %3062 = vsyncadd (%p3843_p0), %s571_s23, 4294967216  ;;  %s582_s8 = scalar_lea.vmem [#allocation8], %s3433_s14  ;;  %s588_s12 = scalar_lea.sflag [#allocation10], %s570_s26 }
  0xc9   : > { %s590_s27 = scalar_lea.vmem [#allocation9], %s3433_s14 }
  0xca   : > { %3064 = dma.done.wait (%p3843_p0), %s588_s12, 16  }
  0xcb   : > { %3066 = vsyncadd (%p3843_p0), %s588_s12, 4294967280  ;;  %p3844_p10 = scmp.eq.s32.totalorder %s3227_s22, 0 }
  0xcd   : > { %3068 = dma.done.wait (%p3844_p10), [#allocation10], 16   ;;  %p3845_p12 = pmov %p3844_p10 }
  0xce   : > { %p3846_p2 = pmov %p3844_p10 }
  0xcf   : > { %3070 = vsyncadd (%p3845_p12), [#allocation10], 4294967280 }
  0xd0   : > { %3072 = dma.done.wait (%p3846_p2), [#allocation13], 272   ;;  %p3847_p4 = pmov %p3846_p2 }
  0xd1   : > { %p3848_p6 = pmov %p3846_p2 }
  0xd2   : > { %3074 = vsyncadd (%p3847_p4), [#allocation13], 4294967024 }
  0xd3   : > { %3076 = dma.done.wait (%p3848_p6), [#allocation16], 256   ;;  %p3849_p9 = pmov %p3846_p2 }
  0xd4   : > { %vm688_vm0 = vcmask 261120   ;;  %v667_v0 = vld [vmem:[%s565_s4] sm:$0xf]  ;;  %v3109_v9 = vmov 0.0   ;;  %vm3110_vm1 = vmmov 0   ;;  %s3111_s16 = smov 120   ;;  %v674_v37 = vlaneseq }
  0xd5   : > { %3078 = vsyncadd (%p3849_p9), [#allocation16], 4294967040  ;;  %v3468_v1 = vunpack.c.l.bf16 %v667_v0  ;;  %v2743_v8 = vld [vmem:[%s3778_s6 + $0x8] sm:$0xff]   ;;  %2467 = vmatprep.subr.bf16.mxu1 %v3109_v9  ;;  %2471 = vmatprep.mubr.msk.bf16.mxu1 %vm3110_vm1, %v3109_v9  ;;  %v2744_v10 = vld [vmem:[%s3778_s6] sm:$0xff]   ;;  %s3112_s25 = smov 96   ;;  %s3113_s15 = smov 88  }
  0xd6   : > { %2468 = vmatpush3.bf16.msra.mxu1 %v2743_v8  ;;  %2481 = vmatprep.subr.bf16.mxu0 %v3109_v9  ;;  %v3488_v15 = vld [vmem:[#allocation11] ss:$0 sm:$0xff]  ;;  %v3490_v17 = vld [vmem:[#allocation12] ss:$0 sm:$0xff]  ;;  %s3114_s28 = smov 80   ;;  %s3115_s29 = smov 112  }
  0xd7   : > { %v689_v2 = vsel %vm688_vm0, %v3468_v1, 0.0  ;;  %2469 = vmatprep.subr.bf16.mxu1 %v3109_v9  ;;  %2483 = vmatprep.mubr.msk.bf16.mxu0 %vm3110_vm1, %v3109_v9  ;;  %s3116_s5 = smov 72   ;;  %s3117_s1 = smov 104   ;;  %vm785_vm2 = vcmask 64512   ;;  %v675_v38 = vshrl.u32 %v674_v37, 7  ;;  %v677_v39 = vand.u32 127, %v674_v37 }
  0xd8   : > { %690 = vadd.xlane.f32.xlu0 %v689_v2  ;;  %v2351_v40 = vld [vmem:[%s582_s8] ss:$0 sm:$0xff]  ;;  %s3118_s30 = smov 64   ;;  %s3119_s4 = smov 56   ;;  %vm849_vm4 = vcmask 1043456   ;;  %vm894_vm5 = vcmask 60416  }
  0xd9   : > { %vm678_vm3 = vcmp.gt.s32.totalorder %v677_v39, %v675_v38  ;;  %s3120_s26 = smov 48   ;;  %s3121_s23 = smov 40   ;;  %vm1013_vm6 = vcmask 126016   ;;  %vm1132_vm7 = vcmask 191616   ;;  %vm1251_vm8 = vcmask 257216  }
  0xda   : > { %2470 = vmatpush3.bf16.msra.mxu1 %v2744_v10  ;;  %v679_v41 = vsel %vm678_vm3, -1e+09, %v3109_v9  ;;  %s3122_s8 = smov 8   ;;  %s3123_s18 = smov 16   ;;  %vm2100_vm9 = vcmask 523264   ;;  %vm2146_vm10 = vcmask 257024  }
  0xdb   : > { %2475 = vmatprep.subr.bf16.mxu1 %v3109_v9  ;;  %v686_v42 = vadd.f32 %v2351_v40, %v679_v41  ;;  %s3850_s20 = sld [smem:[#allocation34_spill]] }
  0xdc   : > { %s3855_s13 = sld [smem:[#allocation38_spill]] }
  0xdd   : > { %v687_v43 = vmax.f32 %v686_v42, -1e+09 }
 0x161   : > { %v691_v3 = vpop.xlane.xlu0 %690 }
 0x162   : > { %v693_v4 = vmul.f32 0.03125, %v691_v3 }
 0x164   : > { %v694_v5 = vsub.f32 %v3468_v1, %v693_v4 }
 0x166   : > { %v695_v6 = vmul.f32 %v694_v5, %v694_v5 }
 0x168   : > { %v696_v7 = vsel %vm688_vm0, %v695_v6, 0.0 }
 0x169   : > { %697 = vadd.xlane.f32.xlu0 %v696_v7 }
 0x1f2   : > { %v698_v11 = vpop.xlane.xlu0 %697 }
 0x1f3   : > { %v699_v12 = vmul.f32 0.03125, %v698_v11 }
 0x1f5   : > { %v700_v13 = vadd.f32 1e-06, %v699_v12 }
 0x1f7   : > { %2759 = vrsqrt.f32 %v700_v13 }
 0x204   : > { %v2760_v14 = vpop.eup %2759 }
 0x205   : > { %v702_v16 = vmul.f32 %v2760_v14, %v694_v5 }
 0x207   : > { %v709_v18 = vmul.f32 %v3488_v15, %v702_v16 }
 0x209   : > { %v716_v19 = vadd.f32 %v3490_v17, %v709_v18 }
 0x20b   : > { %v717_v20 = vpack.c.bf16 %v716_v19, %v716_v19 }
 0x20d   : > { %2472 = vmatmul.mubr.msk.bf16.vlgmr.msra.gmra.mxu1 %vm688_vm0, %v717_v20 }
 0x20e   : > { %2477 = vmatprep.mubr.msk.bf16.mxu1 %vm3110_vm1, %v3109_v9 }
 0x2cd   : > { %v771_v21 = vpop.f32.mrf.mxu1 }
 0x2ce   : > { %v3497_v22 = vpack.c.bf16 %v771_v21, %v771_v21 }
 0x2cf   : > { %v2473_v23 = vpop.f32.mrf.mxu1 }
 0x2d0   : > { %896 = vrot.lane.b32.xlu0 %v3497_v22, %s3111_s16  ;;  %783 = vrot.lane.b32.xlu1 %v3497_v22, %s3112_s25 }
 0x2d1   : > { %v774_v24 = vpop.f32.mrf.mxu1 }
 0x2d3   : > { %v2474_v25 = vpop.f32.mrf.mxu1 }
 0x2d4   : > { %898 = vrot.lane.b32.xlu1 %v3497_v22, %s3113_s15 }
 0x2d8   : > { %1017 = vrot.lane.b32.xlu1 %v3497_v22, %s3114_s28 }
 0x2dc   : > { %1015 = vrot.lane.b32.xlu1 %v3497_v22, %s3115_s29 }
 0x2e0   : > { %1136 = vrot.lane.b32.xlu1 %v3497_v22, %s3116_s5 }
 0x2e4   : > { %1134 = vrot.lane.b32.xlu1 %v3497_v22, %s3117_s1 }
 0x342   : > { %v784_v26 = vpop.permute.xlu1 %783  ;;  %v897_v31 = vpop.permute.xlu0 %896 }
 0x343   : > { %v790_v27 = vsel %vm785_vm2, %v784_v26, 0 }
 0x344   : > { %2476 = vmatpush3.bf16.xpose.msra.mxu1 %v790_v27 }
 0x345   : > { %2487 = vmatprep.subr.bf16.mxu1 %v3109_v9 }
 0x346   : > { %v899_v28 = vpop.permute.xlu1 %898 }
 0x347   : > { %v904_v29 = vsel %vm785_vm2, %v899_v28, 0 }
 0x34a   : > { %v1018_v30 = vpop.permute.xlu1 %1017 }
 0x34b   : > { %2478 = vmatmul.mubr.msk.bf16.vlgmr.msra.gmra.mxu1 %vm785_vm2, %v3497_v22  ;;  %v1023_v33 = vsel %vm785_vm2, %v1018_v30, 0 }
 0x34c   : > { %2488 = vmatpush3.bf16.xpose.msra.mxu1 %v904_v29  ;;  %2489 = vmatprep.mubr.msk.bf16.mxu1 %vm3110_vm1, %v3109_v9 }
 0x34d   : > { %2499 = vmatprep.subr.bf16.mxu1 %v3109_v9 }
 0x34e   : > { %v1016_v32 = vpop.permute.xlu1 %1015 }
 0x352   : > { %v1137_v34 = vpop.permute.xlu1 %1136 }
 0x353   : > { %2490 = vmatmul.mubr.msk.bf16.vlgmr.msra.gmra.mxu1 %vm785_vm2, %v897_v31  ;;  %v1142_v35 = vsel %vm785_vm2, %v1137_v34, 0 }
 0x354   : > { %2500 = vmatpush3.bf16.xpose.msra.mxu1 %v1023_v33  ;;  %2501 = vmatprep.mubr.msk.bf16.mxu1 %vm3110_vm1, %v3109_v9 }
 0x355   : > { %2511 = vmatprep.subr.bf16.mxu1 %v3109_v9 }
 0x356   : > { %v1135_v36 = vpop.permute.xlu1 %1134 }
 0x35b   : > { %2502 = vmatmul.mubr.msk.bf16.vlgmr.msra.gmra.mxu1 %vm785_vm2, %v1016_v32 }
 0x35c   : > { %2512 = vmatpush3.bf16.xpose.msra.mxu1 %v1142_v35  ;;  %2513 = vmatprep.mubr.msk.bf16.mxu1 %vm3110_vm1, %v3109_v9 }
 0x35d   : > { %2523 = vmatprep.subr.bf16.mxu1 %v3109_v9 }
 0x363   : > { %2514 = vmatmul.mubr.msk.bf16.vlgmr.msra.gmra.mxu1 %vm785_vm2, %v1135_v36 }
 0x364   : > { %2527 = vmatprep.mubr.msk.bf16.mxu1 %vm3110_vm1, %v3109_v9 }
 0x40b   : > { %v826_v44 = vpop.f32.mrf.mxu1 }
 0x40c   : > { %v827_v45 = vadd.f32 %v826_v44, %v687_v43 }
 0x40d   : > { %v2479_v46 = vpop.f32.mrf.mxu1 }
 0x40e   : > { %v832_v47 = vsel %vm785_vm2, %v827_v45, -inf }
 0x40f   : > { %833 = vmax.xlane.f32.xlu1 %v832_v47  ;;  %v829_v48 = vpop.f32.mrf.mxu1 }
 0x411   : > { %v2480_v49 = vpop.f32.mrf.mxu1 }
 0x413   : > { %v940_v50 = vpop.f32.mrf.mxu1 }
 0x414   : > { %v941_v51 = vadd.f32 %v940_v50, %v687_v43 }
 0x415   : > { %v2491_v52 = vpop.f32.mrf.mxu1 }
 0x416   : > { %v946_v53 = vsel %vm785_vm2, %v941_v51, -inf }
 0x417   : > { %947 = vmax.xlane.f32.xlu0 %v946_v53  ;;  %v943_v54 = vpop.f32.mrf.mxu1 }
 0x419   : > { %v2492_v55 = vpop.f32.mrf.mxu1 }
 0x41b   : > { %v1059_v56 = vpop.f32.mrf.mxu1 }
 0x41c   : > { %v1060_v57 = vadd.f32 %v1059_v56, %v687_v43 }
 0x41d   : > { %v2503_v58 = vpop.f32.mrf.mxu1 }
 0x41e   : > { %v1065_v59 = vsel %vm785_vm2, %v1060_v57, -inf }
 0x41f   : > { %1066 = vmax.xlane.f32.xlu1 %v1065_v59  ;;  %v1062_v60 = vpop.f32.mrf.mxu1 }
 0x421   : > { %v2504_v61 = vpop.f32.mrf.mxu1 }
 0x423   : > { %v1178_v62 = vpop.f32.mrf.mxu1 }
 0x424   : > { %v1179_v63 = vadd.f32 %v1178_v62, %v687_v43  ;;  %v2745_v62 = vld [vmem:[%s3779_s7 + $0x8] sm:$0xff]  }
 0x425   : > { %v2515_v0 = vpop.f32.mrf.mxu1  ;;  %2524 = vmatpush3.bf16.msra.mxu1 %v2745_v62 }
 0x426   : > { %v1184_v2 = vsel %vm785_vm2, %v1179_v63, -inf  ;;  %v2746_v0 = vld [vmem:[%s3779_s7] sm:$0xff]   ;;  %2525 = vmatprep.subr.bf16.mxu1 %v3109_v9 }
 0x427   : > { %1185 = vmax.xlane.f32.xlu0 %v1184_v2  ;;  %v1181_v3 = vpop.f32.mrf.mxu1 }
 0x429   : > { %v2516_v4 = vpop.f32.mrf.mxu1  ;;  %2526 = vmatpush3.bf16.msra.mxu1 %v2746_v0 }
 0x42a   : > { %2539 = vmatprep.subr.bf16.mxu1 %v3109_v9 }
 0x498   : > { %v834_v5 = vpop.xlane.xlu1 %833 }
 0x499   : > { %v835_v6 = vsub.f32 %v827_v45, %v834_v5 }
 0x49b   : > { %v836_v7 = vmul.f32 1.442695, %v835_v6 }
 0x49d   : > { %2761 = vpow2.f32 %v836_v7 }
 0x4a0   : > { %v948_v8 = vpop.xlane.xlu0 %947 }
 0x4a1   : > { %v949_v10 = vsub.f32 %v941_v51, %v948_v8 }
 0x4a3   : > { %v950_v11 = vmul.f32 1.442695, %v949_v10 }
 0x4a5   : > { %2763 = vpow2.f32 %v950_v11 }
 0x4a8   : > { %v1067_v24 = vpop.xlane.xlu1 %1066 }
 0x4a9   : > { %v1068_v25 = vsub.f32 %v1060_v57, %v1067_v24 }
 0x4aa   : > { %v2762_v12 = vpop.eup %2761 }
 0x4ab   : > { %v838_v13 = vsel %vm785_vm2, %v2762_v12, 0.0  ;;  %v1069_v26 = vmul.f32 1.442695, %v1068_v25 }
 0x4ac   : > { %839 = vadd.xlane.f32.xlu1 %v838_v13 }
 0x4b0   : > { %v1186_v14 = vpop.xlane.xlu0 %1185 }
 0x4b1   : > { %v1187_v16 = vsub.f32 %v1179_v63, %v1186_v14 }
 0x4b2   : > { %v2764_v18 = vpop.eup %2763 }
 0x4b3   : > { %v1188_v19 = vmul.f32 1.442695, %v1187_v16  ;;  %v952_v20 = vsel %vm785_vm2, %v2764_v18, 0.0 }
 0x4b4   : > { %953 = vadd.xlane.f32.xlu0 %v952_v20 }
 0x4b5   : > { %2765 = vpow2.f32 %v1188_v19 }
 0x4b6   : > { %2767 = vpow2.f32 %v1069_v26 }
 0x4bd   : > { %844 = vrot.lane.b32.xlu1 %v3497_v22, %s3118_s30  ;;  %s3808_s30 = smov 24  }
 0x4c2   : > { %v2766_v21 = vpop.eup %2765 }
 0x4c3   : > { %v1190_v23 = vsel %vm785_vm2, %v2766_v21, 0.0  ;;  %v2768_v27 = vpop.eup %2767 }
 0x4c4   : > { %1191 = vadd.xlane.f32.xlu0 %v1190_v23  ;;  %v1071_v28 = vsel %vm785_vm2, %v2768_v27, 0.0 }
 0x4da   : > { %958 = vrot.lane.b32.xlu0 %v3497_v22, %s3119_s4  ;;  %s3851_s4 = smov %s3850_s20 }
 0x4e1   : > { %1072 = vadd.xlane.f32.xlu1 %v1071_v28 }
 0x4f2   : > { %1077 = vrot.lane.b32.xlu1 %v3497_v22, %s3120_s26  ;;  %s2403_s26 = sshll.u32 %s3227_s22, 6  ;;  %s3125_s22 = smov [#allocation17]  }
 0x4f6   : > { %1196 = vrot.lane.b32.xlu1 %v3497_v22, %s3121_s23  ;;  %s3854_s23 = sld [smem:[#allocation36_spill]] }
 0x535   : > { %v840_v29 = vpop.xlane.xlu1 %839 }
 0x536   : > { %2769 = vrcp.f32 %v840_v29 }
 0x539   : > { %v845_v30 = vpop.permute.xlu1 %844 }
 0x53a   : > { %v851_v31 = vsel %vm849_vm4, %v845_v30, 0  ;;  %v2748_v30 = vld [vmem:[%s3781_s9] sm:$0xff]  }
 0x53b   : > { %2482 = vmatpush3.bf16.msra.mxu0 %v851_v31  ;;  %v669_v31 = vld [vmem:[%s574_s17] sm:$0xf]  ;;  %s3852_s17 = smov 24  }
 0x53c   : > { %2493 = vmatprep.subr.bf16.mxu0 %v3109_v9 }
 0x53d   : > { %v954_v32 = vpop.xlane.xlu0 %953 }
 0x53e   : > { %2771 = vrcp.f32 %v954_v32  ;;  %v2749_v32 = vld [vmem:[%s3850_s20 + $0x8] sm:$0xff]   ;;  %s3856_s20 = sld [smem:[#allocation30_spill]] }
 0x543   : > { %v2770_v33 = vpop.eup %2769 }
 0x544   : > { %v842_v34 = vmul.f32 %v2770_v33, %v2762_v12  ;;  %v2750_v33 = vld [vmem:[%s3851_s4] sm:$0xff]   ;;  %p3858_p13 = scmp.ne.s32.totalorder %s3856_s20, 0 }
 0x546   : > { %v843_v35 = vpack.c.bf16 %v842_v34, %v842_v34 }
 0x548   : > { %2484 = vmatmul.mubr.msk.bf16.vlgmr.msra.gmra.mxu0 %vm785_vm2, %v843_v35 }
 0x549   : > { %2495 = vmatprep.mubr.msk.bf16.mxu0 %vm3110_vm1, %v3109_v9 }
 0x54b   : > { %v2772_v22 = vpop.eup %2771 }
 0x54c   : > { %v956_v37 = vmul.f32 %v2772_v22, %v2764_v18 }
 0x54d   : > { %v1192_v36 = vpop.xlane.xlu0 %1191 }
 0x54e   : > { %v957_v40 = vpack.c.bf16 %v956_v37, %v956_v37 }
 0x551   : > { %v959_v38 = vpop.permute.xlu0 %958 }
 0x552   : > { %v964_v39 = vsel %vm849_vm4, %v959_v38, 0 }
 0x553   : > { %2494 = vmatpush3.bf16.msra.mxu0 %v964_v39 }
 0x554   : > { %2505 = vmatprep.subr.bf16.mxu0 %v3109_v9 }
 0x556   : > { %2496 = vmatmul.mubr.msk.bf16.vlgmr.msra.gmra.mxu0 %vm785_vm2, %v957_v40 }
 0x557   : > { %2507 = vmatprep.mubr.msk.bf16.mxu0 %vm3110_vm1, %v3109_v9 }
 0x56a   : > { %v1073_v41 = vpop.xlane.xlu1 %1072 }
 0x56b   : > { %2773 = vrcp.f32 %v1073_v41 }
 0x56c   : > { %2775 = vrcp.f32 %v1192_v36 }
 0x56e   : > { %v1078_v42 = vpop.permute.xlu1 %1077 }
 0x56f   : > { %v1083_v43 = vsel %vm849_vm4, %v1078_v42, 0 }
 0x570   : > { %2506 = vmatpush3.bf16.msra.mxu0 %v1083_v43 }
 0x571   : > { %2517 = vmatprep.subr.bf16.mxu0 %v3109_v9 }
 0x572   : > { %v1197_v46 = vpop.permute.xlu1 %1196 }
 0x573   : > { %v1202_v49 = vsel %vm849_vm4, %v1197_v46, 0 }
 0x578   : > { %v2774_v44 = vpop.eup %2773 }
 0x579   : > { %v1075_v45 = vmul.f32 %v2774_v44, %v2768_v27  ;;  %v2776_v48 = vpop.eup %2775 }
 0x57a   : > { %v1194_v50 = vmul.f32 %v2776_v48, %v2766_v21 }
 0x57b   : > { %v1076_v47 = vpack.c.bf16 %v1075_v45, %v1075_v45 }
 0x57c   : > { %v1195_v51 = vpack.c.bf16 %v1194_v50, %v1194_v50 }
 0x57d   : > { %2508 = vmatmul.mubr.msk.bf16.vlgmr.msra.gmra.mxu0 %vm785_vm2, %v1076_v47 }
 0x57e   : > { %2518 = vmatpush3.bf16.msra.mxu0 %v1202_v49  ;;  %2519 = vmatprep.mubr.msk.bf16.mxu0 %vm3110_vm1, %v3109_v9 }
 0x57f   : > { %2531 = vmatprep.subr.bf16.mxu0 %v3109_v9 }
 0x585   : > { %2520 = vmatmul.mubr.msk.bf16.vlgmr.msra.gmra.mxu0 %vm785_vm2, %v1195_v51 }
 0x586   : > { %2535 = vmatprep.mubr.msk.bf16.mxu0 %vm3110_vm1, %v3109_v9  ;;  %2532 = vmatpush3.bf16.msra.mxu0 %v2749_v32 }
 0x587   : > { %2533 = vmatprep.subr.bf16.mxu0 %v3109_v9 }
 0x58a   : > { %2534 = vmatpush3.bf16.msra.mxu0 %v2750_v33 }
 0x58b   : > { %2547 = vmatprep.subr.bf16.mxu0 %v3109_v9 }
 0x608   : > { %v887_v52 = vpop.f32.mrf.mxu0 }
 0x609   : > { %v893_v53 = vpack.c.bf16 %v887_v52, %v887_v52 }
 0x60a   : > { %v2485_v54 = vpop.f32.mrf.mxu0 }
 0x60b   : > { %895 = vst.msk [vmem:[#allocation2] sm:$0xf] %vm894_vm5, %v893_v53 }
 0x60c   : > { %v890_v55 = vpop.f32.mrf.mxu0 }
 0x60e   : > { %v2486_v56 = vpop.f32.mrf.mxu0 }
 0x616   : > { %v1000_v57 = vpop.f32.mrf.mxu0 }
 0x617   : > { %v2406_v58 = vpack.c.bf16 %v1000_v57, %v1000_v57 }
 0x618   : > { %v2497_v59 = vpop.f32.mrf.mxu0 }
 0x619   : > { %1010 = vrot.lane.b32.xlu0 %v2406_v58, %s3122_s8 }
 0x61a   : > { %v1003_v60 = vpop.f32.mrf.mxu0 }
 0x61c   : > { %v2498_v61 = vpop.f32.mrf.mxu0 }
 0x61d   : > { %v2377_v61 = vld [vmem:[%s590_s27] ss:$0 sm:$0xff] }
 0x63d   : > { %v1119_v63 = vpop.f32.mrf.mxu0 }
 0x63e   : > { %v2407_v2 = vpack.c.bf16 %v1119_v63, %v1119_v63 }
 0x63f   : > { %v2509_v3 = vpop.f32.mrf.mxu0 }
 0x640   : > { %1129 = vrot.lane.b32.xlu1 %v2407_v2, %s3123_s18 }
 0x641   : > { %v1122_v4 = vpop.f32.mrf.mxu0 }
 0x643   : > { %v2510_v5 = vpop.f32.mrf.mxu0 }
 0x645   : > { %v1238_v6 = vpop.f32.mrf.mxu0 }
 0x646   : > { %v2408_v7 = vpack.c.bf16 %v1238_v6, %v1238_v6 }
 0x647   : > { %v2521_v8 = vpop.f32.mrf.mxu0 }
 0x648   : > { %1248 = vrot.lane.b32.xlu0 %v2408_v7, %s3808_s30 }
 0x649   : > { %v1241_v10 = vpop.f32.mrf.mxu0 }
 0x64b   : > { %v2522_v11 = vpop.f32.mrf.mxu0 }
 0x68b   : > { %v1011_v12 = vpop.permute.xlu0 %1010 }
 0x68c   : > { %1014 = vst.msk [vmem:[#allocation2] sm:$0xf] %vm1013_vm6, %v1011_v12 }
 0x6b2   : > { %v1130_v13 = vpop.permute.xlu1 %1129 }
 0x6b3   : > { %1133 = vst.msk [vmem:[#allocation2] sm:$0xf] %vm1132_vm7, %v1130_v13 }
 0x6ba   : > { %v1249_v14 = vpop.permute.xlu0 %1248 }
 0x6bb   : > { %1252 = vst.msk [vmem:[#allocation2] sm:$0xf] %vm1251_vm8, %v1249_v14 }
 0x6c2   : > { %v1253_v16 = vld [vmem:[#allocation2] sm:$0xf] }
 0x6c3   : > { %2528 = vmatmul.mubr.msk.bf16.vlgmr.msra.gmra.mxu1 %vm688_vm0, %v1253_v16 }
 0x6c4   : > { %2543 = vmatprep.mubr.msk.bf16.mxu1 %vm3110_vm1, %v3109_v9 }
 0x783   : > { %v1303_v18 = vpop.f32.mrf.mxu1 }
 0x784   : > { %v3588_v19 = vadd.f32 %v1303_v18, %v3468_v1  ;;  %v2747_v1 = vld [vmem:[%s3781_s9 + $0x8] sm:$0xff]  }
 0x785   : > { %v2529_v20 = vpop.f32.mrf.mxu1  ;;  %2540 = vmatpush3.bf16.msra.mxu1 %v2747_v1 }
 0x786   : > { %v1310_v21 = vsel %vm688_vm0, %v3588_v19, 0.0  ;;  %2541 = vmatprep.subr.bf16.mxu1 %v3109_v9 }
 0x787   : > { %1311 = vadd.xlane.f32.xlu1 %v1310_v21  ;;  %v1306_v23 = vpop.f32.mrf.mxu1 }
 0x789   : > { %v2530_v24 = vpop.f32.mrf.mxu1  ;;  %2542 = vmatpush3.bf16.msra.mxu1 %v2748_v30 }
 0x78a   : > { %2553 = vmatprep.subr.bf16.mxu1 %v3109_v9 }
 0x78c   : > { %2544 = vmatmul.mubr.msk.bf16.vlgmr.msra.gmra.mxu1 %vm688_vm0, %v669_v31 }
 0x78d   : > { %2555 = vmatprep.mubr.msk.bf16.mxu1 %vm3110_vm1, %v3109_v9 }
 0x810   : > { %v1312_v25 = vpop.xlane.xlu1 %1311 }
 0x811   : > { %v1313_v26 = vmul.f32 0.03125, %v1312_v25 }
 0x813   : > { %v1314_v27 = vsub.f32 %v3588_v19, %v1313_v26 }
 0x815   : > { %v1315_v28 = vmul.f32 %v1314_v27, %v1314_v27 }
 0x817   : > { %v1316_v29 = vsel %vm688_vm0, %v1315_v28, 0.0 }
 0x818   : > { %1317 = vadd.xlane.f32.xlu0 %v1316_v29 }
 0x84c   : > { %v1439_v41 = vpop.f32.mrf.mxu1 }
 0x84d   : > { %v3620_v42 = vpack.c.bf16 %v1439_v41, %v1439_v41 }
 0x84e   : > { %v2545_v43 = vpop.f32.mrf.mxu1 }
 0x84f   : > { %1568 = vrot.lane.b32.xlu0 %v3620_v42, %s3111_s16  ;;  %v1460_v44 = vsel %vm785_vm2, %v3620_v42, 0 }
 0x850   : > { %v1442_v45 = vpop.f32.mrf.mxu1 }
 0x852   : > { %v2546_v46 = vpop.f32.mrf.mxu1 }
 0x8a1   : > { %v1318_v34 = vpop.xlane.xlu0 %1317 }
 0x8a2   : > { %v1319_v35 = vmul.f32 0.03125, %v1318_v34 }
 0x8a4   : > { %v1320_v22 = vadd.f32 1e-06, %v1319_v35 }
 0x8a6   : > { %2777 = vrsqrt.f32 %v1320_v22 }
 0x8b3   : > { %v2778_v36 = vpop.eup %2777 }
 0x8b4   : > { %v1322_v37 = vmul.f32 %v2778_v36, %v1314_v27 }
 0x8b6   : > { %v1323_v38 = vmul.f32 %v3488_v15, %v1322_v37 }
 0x8b8   : > { %v1324_v39 = vadd.f32 %v3490_v17, %v1323_v38 }
 0x8ba   : > { %v1325_v40 = vpack.c.bf16 %v1324_v39, %v1324_v39 }
 0x8bc   : > { %2536 = vmatmul.mubr.msk.bf16.vlgmr.msra.gmra.mxu0 %vm688_vm0, %v1325_v40 }
 0x8bd   : > { %2549 = vmatprep.mubr.msk.bf16.mxu0 %vm3110_vm1, %v3109_v9  ;;  %2548 = vmatpush3.bf16.xpose.msra.mxu0 %v1460_v44 }
 0x8be   : > { %2559 = vmatprep.subr.bf16.mxu0 %v3109_v9 }
 0x8c1   : > { %v1569_v47 = vpop.permute.xlu0 %1568 }
 0x8c2   : > { %v1574_v51 = vsel %vm785_vm2, %v1569_v47, 0 }
 0x97c   : > { %v1379_v48 = vpop.f32.mrf.mxu0 }
 0x97d   : > { %v1385_v49 = vpack.c.bf16 %v1379_v48, %v1379_v48 }
 0x97e   : > { %v2537_v50 = vpop.f32.mrf.mxu0 }
 0x97f   : > { %1566 = vrot.lane.b32.xlu1 %v1385_v49, %s3111_s16  ;;  %1684 = vrot.lane.b32.xlu0 %v1385_v49, %s3115_s29 }
 0x980   : > { %2550 = vmatmul.mubr.msk.bf16.vlgmr.msra.gmra.mxu0 %vm785_vm2, %v1385_v49  ;;  %v1382_v52 = vpop.f32.mrf.mxu0 }
 0x981   : > { %2560 = vmatpush3.bf16.xpose.msra.mxu0 %v1574_v51  ;;  %2561 = vmatprep.mubr.msk.bf16.mxu0 %vm3110_vm1, %v3109_v9 }
 0x982   : > { %v2538_v53 = vpop.f32.mrf.mxu0  ;;  %2571 = vmatprep.subr.bf16.mxu0 %v3109_v9 }
 0x983   : > { %1686 = vrot.lane.b32.xlu1 %v3620_v42, %s3115_s29  ;;  %1802 = vrot.lane.b32.xlu0 %v1385_v49, %s3117_s1 }
 0x987   : > { %1804 = vrot.lane.b32.xlu1 %v3620_v42, %s3117_s1 }
 0x9f1   : > { %v1567_v54 = vpop.permute.xlu1 %1566  ;;  %v1685_v58 = vpop.permute.xlu0 %1684 }
 0x9f2   : > { %2562 = vmatmul.mubr.msk.bf16.vlgmr.msra.gmra.mxu0 %vm785_vm2, %v1567_v54 }
 0x9f3   : > { %2573 = vmatprep.mubr.msk.bf16.mxu0 %vm3110_vm1, %v3109_v9 }
 0x9f5   : > { %v1687_v55 = vpop.permute.xlu1 %1686  ;;  %v1803_v60 = vpop.permute.xlu0 %1802 }
 0x9f6   : > { %v1692_v56 = vsel %vm785_vm2, %v1687_v55, 0 }
 0x9f7   : > { %2572 = vmatpush3.bf16.xpose.msra.mxu0 %v1692_v56 }
 0x9f8   : > { %2583 = vmatprep.subr.bf16.mxu0 %v3109_v9 }
 0x9f9   : > { %v1805_v57 = vpop.permute.xlu1 %1804 }
 0x9fa   : > { %v1810_v59 = vsel %vm785_vm2, %v1805_v57, 0 }
 0x9fe   : > { %2574 = vmatmul.mubr.msk.bf16.vlgmr.msra.gmra.mxu0 %vm785_vm2, %v1685_v58 }
 0x9ff   : > { %2584 = vmatpush3.bf16.xpose.msra.mxu0 %v1810_v59  ;;  %2585 = vmatprep.mubr.msk.bf16.mxu0 %vm3110_vm1, %v3109_v9 }
 0xa00   : > { %2595 = vmatprep.subr.bf16.mxu0 %v3109_v9 }
 0xa06   : > { %2586 = vmatmul.mubr.msk.bf16.vlgmr.msra.gmra.mxu0 %vm785_vm2, %v1803_v60 }
 0xa07   : > { %2599 = vmatprep.mubr.msk.bf16.mxu0 %vm3110_vm1, %v3109_v9 }
 0xa40   : > { %v1496_v62 = vpop.f32.mrf.mxu0 }
 0xa41   : > { %v1497_v63 = vadd.f32 %v2377_v61, %v1496_v62 }
 0xa42   : > { %v2551_v0 = vpop.f32.mrf.mxu0 }
 0xa43   : > { %v1502_v2 = vsel %vm785_vm2, %v1497_v63, -inf }
 0xa44   : > { %1503 = vmax.xlane.f32.xlu1 %v1502_v2  ;;  %v1499_v3 = vpop.f32.mrf.mxu0 }
 0xa46   : > { %v2552_v4 = vpop.f32.mrf.mxu0 }
 0xab2   : > { %v1610_v5 = vpop.f32.mrf.mxu0 }
 0xab3   : > { %v1611_v6 = vadd.f32 %v2377_v61, %v1610_v5 }
 0xab4   : > { %v2563_v7 = vpop.f32.mrf.mxu0 }
 0xab5   : > { %v1616_v8 = vsel %vm785_vm2, %v1611_v6, -inf }
 0xab6   : > { %1617 = vmax.xlane.f32.xlu0 %v1616_v8  ;;  %v1613_v10 = vpop.f32.mrf.mxu0 }
 0xab8   : > { %v2564_v11 = vpop.f32.mrf.mxu0 }
 0xabe   : > { %v1728_v12 = vpop.f32.mrf.mxu0 }
 0xabf   : > { %v1729_v13 = vadd.f32 %v2377_v61, %v1728_v12 }
 0xac0   : > { %v2575_v14 = vpop.f32.mrf.mxu0 }
 0xac1   : > { %v1734_v16 = vsel %vm785_vm2, %v1729_v13, -inf }
 0xac2   : > { %1735 = vmax.xlane.f32.xlu0 %v1734_v16  ;;  %v1731_v18 = vpop.f32.mrf.mxu0 }
 0xac4   : > { %v2576_v20 = vpop.f32.mrf.mxu0 }
 0xac6   : > { %v1846_v21 = vpop.f32.mrf.mxu0 }
 0xac7   : > { %v1847_v23 = vadd.f32 %v2377_v61, %v1846_v21 }
 0xac8   : > { %v2587_v24 = vpop.f32.mrf.mxu0 }
 0xac9   : > { %v1852_v25 = vsel %vm785_vm2, %v1847_v23, -inf }
 0xaca   : > { %1853 = vmax.xlane.f32.xlu1 %v1852_v25  ;;  %v1849_v26 = vpop.f32.mrf.mxu0 }
 0xacb   : > { %v2752_v26 = vld [vmem:[#allocation14] sm:$0xff]  }
 0xacc   : > { %v2588_v27 = vpop.f32.mrf.mxu0 }
 0xacd   : > { %v1504_v28 = vpop.xlane.xlu1 %1503 }
 0xace   : > { %v1505_v29 = vsub.f32 %v1497_v63, %v1504_v28 }
 0xad0   : > { %v1506_v1 = vmul.f32 1.442695, %v1505_v29 }
 0xad2   : > { %2779 = vpow2.f32 %v1506_v1 }
 0xadf   : > { %v2780_v30 = vpop.eup %2779 }
 0xae0   : > { %v1508_v31 = vsel %vm785_vm2, %v2780_v30, 0.0 }
 0xae1   : > { %1509 = vadd.xlane.f32.xlu0 %v1508_v31 }
 0xb3f   : > { %v1618_v32 = vpop.xlane.xlu0 %1617 }
 0xb40   : > { %v1619_v33 = vsub.f32 %v1611_v6, %v1618_v32 }
 0xb42   : > { %v1620_v34 = vmul.f32 1.442695, %v1619_v33 }
 0xb44   : > { %2781 = vpow2.f32 %v1620_v34 }
 0xb4b   : > { %v1736_v35 = vpop.xlane.xlu0 %1735 }
 0xb4c   : > { %v1737_v22 = vsub.f32 %v1729_v13, %v1736_v35 }
 0xb4e   : > { %v1738_v36 = vmul.f32 1.442695, %v1737_v22 }
 0xb50   : > { %2783 = vpow2.f32 %v1738_v36 }
 0xb51   : > { %v2782_v37 = vpop.eup %2781 }
 0xb52   : > { %v1622_v38 = vsel %vm785_vm2, %v2782_v37, 0.0 }
 0xb53   : > { %1623 = vadd.xlane.f32.xlu1 %v1622_v38  ;;  %v1854_v41 = vpop.xlane.xlu1 %1853 }
 0xb54   : > { %v1855_v43 = vsub.f32 %v1847_v23, %v1854_v41  ;;  %v2751_v23 = vld [vmem:[#allocation14 + $0x8] sm:$0xff]  }
 0xb55   : > { %2596 = vmatpush3.bf16.msra.mxu0 %v2751_v23 }
 0xb56   : > { %v1856_v44 = vmul.f32 1.442695, %v1855_v43  ;;  %2597 = vmatprep.subr.bf16.mxu0 %v3109_v9 }
 0xb58   : > { %2785 = vpow2.f32 %v1856_v44 }
 0xb59   : > { %2598 = vmatpush3.bf16.msra.mxu0 %v2752_v26 }
 0xb5a   : > { %2611 = vmatprep.subr.bf16.mxu0 %v3109_v9 }
 0xb5d   : > { %v2784_v39 = vpop.eup %2783 }
 0xb5e   : > { %v1740_v40 = vsel %vm785_vm2, %v2784_v39, 0.0 }
 0xb5f   : > { %1741 = vadd.xlane.f32.xlu0 %v1740_v40 }
 0xb64   : > { %1628 = vrot.lane.b32.xlu1 %v3620_v42, %s3113_s15 }
 0xb65   : > { %v2786_v45 = vpop.eup %2785 }
 0xb66   : > { %v1858_v46 = vsel %vm785_vm2, %v2786_v45, 0.0 }
 0xb6a   : > { %v1510_v47 = vpop.xlane.xlu0 %1509 }
 0xb6b   : > { %2787 = vrcp.f32 %v1510_v47 }
 0xb75   : > { %1515 = vrot.lane.b32.xlu0 %v3620_v42, %s3112_s25  ;;  %s3853_s25 = sld [smem:[#allocation37_spill]] }
 0xb78   : > { %v2788_v49 = vpop.eup %2787 }
 0xb79   : > { %1864 = vrot.lane.b32.xlu0 %v3620_v42, %s3116_s5  ;;  %v1512_v51 = vmul.f32 %v2788_v49, %v2780_v30  ;;  %v2754_v49 = vld [vmem:[#allocation15] sm:$0xff]   ;;  %s2149_s5 = scalar_lea.sflag [#allocation5], %s3433_s14 }
 0xb7b   : > { %v1513_v55 = vpack.c.bf16 %v1512_v51, %v1512_v51 }
 0xb88   : > { %1859 = vadd.xlane.f32.xlu1 %v1858_v46 }
 0xb99   : > { %1746 = vrot.lane.b32.xlu1 %v3620_v42, %s3114_s28  ;;  %s3857_s28 = sld [smem:[#allocation39_spill]] }
 0xb9f   : > { %s3735_s29 = scalar_lea.hbm %s3857_s28, %s2403_s26 }
 0xbdc   : > { %v1624_v48 = vpop.xlane.xlu1 %1623 }
 0xbdd   : > { %2789 = vrcp.f32 %v1624_v48  ;;  %v2753_v48 = vld [vmem:[#allocation15 + $0x8] sm:$0xff]  }
 0xbe0   : > { %v1629_v54 = vpop.permute.xlu1 %1628 }
 0xbe1   : > { %v1634_v57 = vsel %vm849_vm4, %v1629_v54, 0 }
 0xbe8   : > { %v1742_v50 = vpop.xlane.xlu0 %1741 }
 0xbe9   : > { %2791 = vrcp.f32 %v1742_v50  ;;  %v2756_v50 = vld [vmem:[%s3853_s25 + $0x10] sm:$0xff]  }
 0xbea   : > { %v2790_v56 = vpop.eup %2789 }
 0xbeb   : > { %v1626_v42 = vmul.f32 %v2790_v56, %v2782_v37 }
 0xbec   : > { %v1516_v52 = vpop.permute.xlu0 %1515 }
 0xbed   : > { %v1521_v53 = vsel %vm849_vm4, %v1516_v52, 0  ;;  %v1627_v58 = vpack.c.bf16 %v1626_v42, %v1626_v42 }
 0xbee   : > { %2554 = vmatpush3.bf16.msra.mxu1 %v1521_v53 }
 0xbef   : > { %2565 = vmatprep.subr.bf16.mxu1 %v3109_v9 }
 0xbf0   : > { %v1865_v0 = vpop.permute.xlu0 %1864 }
 0xbf1   : > { %2556 = vmatmul.mubr.msk.bf16.vlgmr.msra.gmra.mxu1 %vm785_vm2, %v1513_v55  ;;  %v1870_v3 = vsel %vm849_vm4, %v1865_v0, 0 }
 0xbf2   : > { %2566 = vmatpush3.bf16.msra.mxu1 %v1634_v57  ;;  %2567 = vmatprep.mubr.msk.bf16.mxu1 %vm3110_vm1, %v3109_v9 }
 0xbf3   : > { %2577 = vmatprep.subr.bf16.mxu1 %v3109_v9 }
 0xbf6   : > { %v2792_v59 = vpop.eup %2791 }
 0xbf7   : > { %v1744_v61 = vmul.f32 %v2792_v59, %v2784_v39  ;;  %v2758_v59 = vld [vmem:[%s3853_s25] sm:$0xff]  }
 0xbf9   : > { %2568 = vmatmul.mubr.msk.bf16.vlgmr.msra.gmra.mxu1 %vm785_vm2, %v1627_v58  ;;  %v1745_v2 = vpack.c.bf16 %v1744_v61, %v1744_v61  ;;  %v2757_v58 = vld [vmem:[%s3853_s25 + $0x8] sm:$0xff]  }
 0xbfa   : > { %2579 = vmatprep.mubr.msk.bf16.mxu1 %vm3110_vm1, %v3109_v9 }
 0xc11   : > { %v1860_v60 = vpop.xlane.xlu1 %1859 }
 0xc12   : > { %2793 = vrcp.f32 %v1860_v60 }
 0xc15   : > { %v1747_v62 = vpop.permute.xlu1 %1746 }
 0xc16   : > { %v1752_v63 = vsel %vm849_vm4, %v1747_v62, 0 }
 0xc17   : > { %2578 = vmatpush3.bf16.msra.mxu1 %v1752_v63 }
 0xc18   : > { %2589 = vmatprep.subr.bf16.mxu1 %v3109_v9 }
 0xc1a   : > { %2580 = vmatmul.mubr.msk.bf16.vlgmr.msra.gmra.mxu1 %vm785_vm2, %v1745_v2 }
 0xc1b   : > { %2590 = vmatpush3.bf16.msra.mxu1 %v1870_v3  ;;  %2591 = vmatprep.mubr.msk.bf16.mxu1 %vm3110_vm1, %v3109_v9 }
 0xc1c   : > { %2603 = vmatprep.subr.bf16.mxu1 %v3109_v9 }
 0xc1f   : > { %v2794_v4 = vpop.eup %2793 }
 0xc20   : > { %v1862_v5 = vmul.f32 %v2794_v4, %v2786_v45 }
 0xc22   : > { %v1863_v6 = vpack.c.bf16 %v1862_v5, %v1862_v5 }
 0xc24   : > { %2592 = vmatmul.mubr.msk.bf16.vlgmr.msra.gmra.mxu1 %vm785_vm2, %v1863_v6 }
 0xc25   : > { %2607 = vmatprep.mubr.msk.bf16.mxu1 %vm3110_vm1, %v3109_v9  ;;  %2604 = vmatpush3.bf16.msra.mxu1 %v2753_v48 }
 0xc26   : > { %2605 = vmatprep.subr.bf16.mxu1 %v3109_v9 }
 0xc29   : > { %2606 = vmatpush3.bf16.msra.mxu1 %v2754_v49 }
 0xcb1   : > { %v1557_v7 = vpop.f32.mrf.mxu1 }
 0xcb2   : > { %v1563_v8 = vpack.c.bf16 %v1557_v7, %v1557_v7 }
 0xcb3   : > { %v2557_v10 = vpop.f32.mrf.mxu1 }
 0xcb4   : > { %1564 = vst.msk [vmem:[#allocation2] sm:$0xf] %vm894_vm5, %v1563_v8 }
 0xcb5   : > { %v1560_v11 = vpop.f32.mrf.mxu1 }
 0xcb7   : > { %v2558_v12 = vpop.f32.mrf.mxu1 }
 0xcb9   : > { %v1670_v13 = vpop.f32.mrf.mxu1 }
 0xcba   : > { %v2409_v14 = vpack.c.bf16 %v1670_v13, %v1670_v13 }
 0xcbb   : > { %v2569_v16 = vpop.f32.mrf.mxu1 }
 0xcbc   : > { %1680 = vrot.lane.b32.xlu1 %v2409_v14, %s3122_s8 }
 0xcbd   : > { %v1673_v18 = vpop.f32.mrf.mxu1 }
 0xcbf   : > { %v2570_v20 = vpop.f32.mrf.mxu1 }
 0xcda   : > { %v1788_v21 = vpop.f32.mrf.mxu1 }
 0xcdb   : > { %v2410_v24 = vpack.c.bf16 %v1788_v21, %v1788_v21 }
 0xcdc   : > { %v2581_v25 = vpop.f32.mrf.mxu1 }
 0xcdd   : > { %1798 = vrot.lane.b32.xlu0 %v2410_v24, %s3123_s18 }
 0xcde   : > { %v1791_v27 = vpop.f32.mrf.mxu1 }
 0xce0   : > { %v2582_v28 = vpop.f32.mrf.mxu1 }
 0xce4   : > { %v1906_v29 = vpop.f32.mrf.mxu1 }
 0xce5   : > { %v2411_v1 = vpack.c.bf16 %v1906_v29, %v1906_v29 }
 0xce6   : > { %v2593_v30 = vpop.f32.mrf.mxu1 }
 0xce7   : > { %1916 = vrot.lane.b32.xlu1 %v2411_v1, %s3852_s17  ;;  %s665_s17 = scalar_lea.vmem [#allocation17], %s3436_s10  ;;  %s3017_s10 = sshll.u32 %s3125_s22, 4  ;;  %s3018_s10 = int_to_ptr.vmem [resolvable:$false] %s3017_s10 }
 0xce8   : > { %v1909_v31 = vpop.f32.mrf.mxu1  ;;  %s2162_s27 = sshll.u32 %s665_s17, 4  ;;  %s3019_s8 = scalar_lea.vmem %s3018_s10, 128  ;;  %s2163_s27 = int_to_ptr.vmem [resolvable:$true] %s2162_s27 }
 0xce9   : > { %s3013_s1 = scalar_lea.vmem %s2163_s27, 64  ;;  %p3020_p1 = scmp.lt.s32.totalorder %s2163_s27, %s3018_s10 }
 0xcea   : > { %v2594_v32 = vpop.f32.mrf.mxu1  ;;  %p3014_p7 = scmp.ne.s32.totalorder %s2163_s27, %s3013_s1  ;;  %p3021_p3 = scmp.lt.s32.totalorder %s3019_s8, %s3013_s1 }
 0xcec   : > { %p3015_p8 = pnand %p3014_p7, %p3858_p13  ;;  %p3022_p5 = por %p3021_p3, %p3020_p1 }
 0xcee   : > { %p3016_p11 = pneg %p3015_p8 }
 0xcf0   : > { %p3023_p0 = pnand %p3022_p5, %p3016_p11 }
 0xd2e   : > { %v1681_v33 = vpop.permute.xlu1 %1680 }
 0xd2f   : > { %1683 = vst.msk [vmem:[#allocation2] sm:$0xf] %vm1013_vm6, %v1681_v33 }
 0xd4f   : > { %v1799_v34 = vpop.permute.xlu0 %1798 }
 0xd50   : > { %1801 = vst.msk [vmem:[#allocation2] sm:$0xf] %vm1132_vm7, %v1799_v34 }
 0xd59   : > { %v1917_v35 = vpop.permute.xlu1 %1916 }
 0xd5a   : > { %1919 = vst.msk [vmem:[#allocation2] sm:$0xf] %vm1251_vm8, %v1917_v35 }
 0xd61   : > { %v1920_v22 = vld [vmem:[#allocation2] sm:$0xf] }
 0xd62   : > { %2600 = vmatmul.mubr.msk.bf16.vlgmr.msra.gmra.mxu0 %vm688_vm0, %v1920_v22 }
 0xd63   : > { %2619 = vmatprep.mubr.msk.bf16.mxu0 %vm3110_vm1, %v3109_v9 }
 0xe22   : > { %v1970_v36 = vpop.f32.mrf.mxu0 }
 0xe23   : > { %v1976_v37 = vadd.f32 %v1970_v36, %v3588_v19  ;;  %v2755_v19 = vld [vmem:[%s3853_s25 + $0x18] sm:$0xff]  }
 0xe24   : > { %v2601_v38 = vpop.f32.mrf.mxu0  ;;  %2612 = vmatpush3.bf16.msra.mxu0 %v2755_v19 }
 0xe25   : > { %v1977_v39 = vsel %vm688_vm0, %v1976_v37, 0.0  ;;  %2613 = vmatprep.subr.bf16.mxu0 %v3109_v9 }
 0xe26   : > { %1978 = vadd.xlane.f32.xlu0 %v1977_v39  ;;  %v1973_v40 = vpop.f32.mrf.mxu0 }
 0xe28   : > { %v2602_v41 = vpop.f32.mrf.mxu0  ;;  %2614 = vmatpush3.bf16.msra.mxu0 %v2756_v50 }
 0xe29   : > { %2615 = vmatprep.subr.bf16.mxu0 %v3109_v9 }
 0xe2c   : > { %2616 = vmatpush3.bf16.msra.mxu0 %v2757_v58 }
 0xe2d   : > { %2617 = vmatprep.subr.bf16.mxu0 %v3109_v9  ;;  %v2396_v9 = vld [vmem:[%s3855_s13] ss:$0 sm:$0xff] }
 0xe30   : > { %2618 = vmatpush3.bf16.msra.mxu0 %v2758_v59 }
 0xeaf   : > { %v1979_v43 = vpop.xlane.xlu0 %1978 }
 0xeb0   : > { %v1980_v44 = vmul.f32 0.03125, %v1979_v43 }
 0xeb2   : > { %v1981_v45 = vsub.f32 %v1976_v37, %v1980_v44 }
 0xeb4   : > { %v1982_v46 = vmul.f32 %v1981_v45, %v1981_v45 }
 0xeb6   : > { %v1983_v47 = vsel %vm688_vm0, %v1982_v46, 0.0 }
 0xeb7   : > { %1984 = vadd.xlane.f32.xlu1 %v1983_v47 }
 0xf40   : > { %v1985_v51 = vpop.xlane.xlu1 %1984 }
 0xf41   : > { %v1986_v52 = vmul.f32 0.03125, %v1985_v51 }
 0xf43   : > { %v1987_v53 = vadd.f32 1e-06, %v1986_v52 }
 0xf45   : > { %2795 = vrsqrt.f32 %v1987_v53 }
 0xf52   : > { %v2796_v54 = vpop.eup %2795 }
 0xf53   : > { %v1989_v55 = vmul.f32 %v2796_v54, %v1981_v45 }
 0xf55   : > { %v1990_v56 = vmul.f32 %v3488_v15, %v1989_v55  ;;  %v2392_v15 = vld [vmem:[%s3854_s23] ss:$0 sm:$0xff] }
 0xf57   : > { %v1991_v57 = vadd.f32 %v3490_v17, %v1990_v56 }
 0xf59   : > { %v1992_v42 = vpack.c.bf16 %v1991_v57, %v1991_v57 }
 0xf5b   : > { %2608 = vmatmul.mubr.msk.bf16.vlgmr.msra.gmra.mxu1 %vm688_vm0, %v1992_v42 }
0x101b   : > { %v2053_v17 = vpop.f32.mrf.mxu1 }
0x101c   : > { %v2054_v60 = vadd.f32 %v2392_v15, %v2053_v17 }
0x101d   : > { %v2609_v61 = vpop.f32.mrf.mxu1 }
0x101e   : > { %v2059_v62 = vmax.f32 %v2054_v60, 0.0 }
0x101f   : > { %v2056_v63 = vpop.f32.mrf.mxu1 }
0x1020   : > { %v2060_v0 = vpack.c.bf16 %v2059_v62, %v2059_v62 }
0x1021   : > { %v2610_v2 = vpop.f32.mrf.mxu1 }
0x1022   : > { %2620 = vmatmul.mubr.msk.bf16.vlgmr.msra.gmra.mxu0 %vm2100_vm9, %v2060_v0 }
0x10e2   : > { %v2138_v3 = vpop.f32.mrf.mxu0 }
0x10e3   : > { %v2139_v4 = vadd.f32 %v2396_v9, %v2138_v3 }
0x10e4   : > { %v2621_v5 = vpop.f32.mrf.mxu0 }
0x10e5   : > { %v2144_v6 = vadd.f32 %v2139_v4, %v1976_v37 }
0x10e6   : > { %v2141_v7 = vpop.f32.mrf.mxu0 }
0x10e7   : > { %v2145_v8 = vpack.c.bf16 %v2144_v6, %v2144_v6 }
0x10e8   : > { %v2622_v10 = vpop.f32.mrf.mxu0 }
0x10e9   : > { %2147 = vst.msk [vmem:[%s665_s17] sm:$0xf] %vm2146_vm10, %v2145_v8 }
0x10ea   : > { %3026 = shalt.err (!%p3023_p0)
}
0x10eb   : > { %s3027_s18 = scalar_lea.hbm %s3735_s29, 64  ;;  %s3031_s23 = scalar_lea.hbm %s3857_s28, 128 }
0x10ec   : > { %p3028_p10 = scmp.ne.s32.totalorder %s3735_s29, %s3027_s18  ;;  %p3032_p4 = scmp.lt.s32.totalorder %s3735_s29, %s3857_s28 }
0x10ed   : > { %p3033_p6 = scmp.lt.s32.totalorder %s3031_s23, %s3027_s18 }
0x10ee   : > { %p3029_p12 = pnand %p3028_p10, %p3858_p13 }
0x10ef   : > { %p3034_p9 = por %p3033_p6, %p3032_p4 }
0x10f0   : > { %p3030_p2 = pneg %p3029_p12 }
0x10f2   : > { %p3035_p7 = pnand %p3034_p9, %p3030_p2 }
0x10f4   : > { %3038 = shalt.err (!%p3035_p7)
}
0x10f5   : > { %2647 = dma.vmem_to_hbm [thread:$0]  (%p3858_p13), %s2163_s27, 64, %s3735_s29, %s2149_s5  }
0x10f6 PF: > { %s3859_s13 = sld [smem:[#allocation25_spill]]  ;;  %p3862_p11 = scmp.ge.s32.totalorder %s3097_s21, 2 }
0x10f7   : > { %s3860_s26 = sld [smem:[#allocation27_spill]] }
0x10fc   : > { %s2174_s17 = sand.u32 1, %s3859_s13  }
0x10fd   : > { %p3861_p8 = scmp.ne.s32.totalorder %s3860_s26, 0  ;;  %s2175_s16 = scalar_lea.sflag [#allocation5], %s2174_s17 }
0x10ff   : > { %p2676_p1 = pnand %p3862_p11, %p3861_p8 }
0x1101   : > { %p2677_p3 = pneg %p2676_p1 }
0x1103   : > { %3080 = dma.done.wait (%p2677_p3), %s2175_s16, 64  }
0x1104   : > { %3082 = vsyncadd (%p2677_p3), %s2175_s16, 4294967232  ;;  %s3863_s21 = sld [smem:[#allocation28_spill]]  ;;  %s3866_s18 = smov %s3089_s19 }
0x1105   : > { %s3864_s15 = sld [smem:[#allocation26_spill]] }
0x1106   : > { %s3865_s20 = sld [smem:[#allocation29_spill]] }
0x110a   : > { %p36_p5 = scmp.ge.s32.totalorder %s3863_s21, 4  }
0x110b   : > { %s3867_s19 = smov %s3864_s15 }
0x110c   :  { %38 = sbr.rel (!%p36_p5) target bundleno = 21 (0x15), region = 178 }
0x1111   :  { %2180 = vsyncpa [#allocation4], 1 }
0x1112   :  { %2182 = vsyncpa [#allocation4 + $0x1], 1 }
0x1113   :  { %2183 = vsyncpa [#allocation7], 1 }
0x1114   :  { %2185 = vsyncpa [#allocation7 + $0x1], 1 }
0x1115   :  { %2186 = vsyncpa [#allocation10], 1 }
0x1116   :  { %2188 = vsyncpa [#allocation10 + $0x1], 1 }
0x1117   :  { %2189 = vsyncpa [#allocation13], 1 }
0x1118   :  { %2190 = vsyncpa [#allocation16], 1 }
0x1119   :  { %2191 = vsyncpa [#allocation5], 1 }
0x111a   :  { %2193 = vsyncpa [#allocation5 + $0x1], 1 }

</bundles_post_ra>
